<compile_context>
chip_gen: v6e
topology: v6e:2x2x1
jax: 0.10.0
libtpu: 0.0.40
codegen_flags: <defaults>
</compile_context>

<pallas_src>
from functools import partial

import numpy as np
import jax
import jax.numpy as jnp
from jax.experimental import pallas as pl
from jax.experimental.pallas import tpu as pltpu


# ----------------------------- kernel ---------------------------------------


def _fold_and_bcast(C, L):
    """Constant 0/1 matrices mapping (x, c) lanes <-> channels.

    fold  : (L, C), fold[l, c]  = 1 iff l % C == c  (per-lane sums -> per-channel)
    bcast : (C, L), bcast[c, l] = 1 iff l % C == c  (per-channel -> lanes)
    Built from 2-D iota so no lane<->sublane reshape is needed in-kernel.
    """
    r = jax.lax.broadcasted_iota(jnp.int32, (L, C), 0) % C
    c = jax.lax.broadcasted_iota(jnp.int32, (L, C), 1)
    fold = (r == c).astype(jnp.float32)
    rr = jax.lax.broadcasted_iota(jnp.int32, (C, L), 0)
    cc = jax.lax.broadcasted_iota(jnp.int32, (C, L), 1) % C
    bcast = (rr == cc).astype(jnp.float32)
    return fold, bcast


def double_conv_kernel(x_ref, w1_ref, g1_ref, b1_ref, w2_ref, g2_ref, b2_ref,
                       out_ref, xpad_ref):
    """Fused (conv3x3 -> BN(batch stats) -> ReLU) x 2.

    x_ref:     (N, H, W*Cin)           lane-dense input rows (f32), VMEM
    w1_ref:    (3, W*Cin,  W*Cmid)     banded conv-1 weights (ky taps), MXU dtype
    w2_ref:    (3, W*Cmid, W*Cout)     banded conv-2 weights,           MXU dtype
    g*/b*_ref: (1, C)                  BN scale / shift (f32)
    out_ref:   (N*H, W*Cout)           lane-dense f32 output (unmasked vst)
    xpad_ref:  (N, H+2, W*max(Cin,Cmid))  shared H-halo scratch, MXU dtype
    """
    N, H, WCin = x_ref.shape
    WCmid = w2_ref.shape[1]
    WCout = out_ref.shape[-1]
    Cmid = g1_ref.shape[-1]
    Cout = g2_ref.shape[-1]
    W = WCmid // Cmid
    NH = N * H
    Wpad = xpad_ref.shape[-1]
    cdtype = xpad_ref.dtype                   # MXU operand dtype (bf16 or f32)
    inv_cnt = 1.0 / float(NH * W)             # 1 / (N*H*W), Python constant

    # Hoisted 0/1 fold/broadcast constants (built once; reused when the two
    # BN blocks share (C, L), which they do here since Cmid == Cout).
    fold1, bcast1 = _fold_and_bcast(Cmid, WCmid)
    if (Cout, WCout) == (Cmid, WCmid):
        fold2, bcast2 = fold1, bcast1
    else:
        fold2, bcast2 = _fold_and_bcast(Cout, WCout)

    def conv3x3(kin, band_ref):
        # 3 lane-dense MXU matmuls (one per ky tap); the kx taps and the
        # x-direction zero padding are folded into the banded weights, so
        # K = W*Cin and the result is already in (N*H, W*Cout) layout.
        acc = jnp.zeros((NH, band_ref.shape[-1]), jnp.float32)
        for dy in range(3):
            lhs = xpad_ref[:, dy:dy + H, :kin].reshape(NH, kin)   # sublane shift
            acc = acc + jnp.dot(lhs, band_ref[dy],
                                preferred_element_type=jnp.float32)
        return acc

    def bn_relu(acc, gamma, beta, fold, bcast):
        # Training-mode BatchNorm2d: biased variance over (N, H, W), eps=1e-5,
        # all stats in f32 with a centered (two-pass) variance -> no
        # E[x^2]-mean^2 cancellation even with bf16 conv operands.
        s = jnp.sum(acc, axis=0, keepdims=True)                               # (1, L)
        mean_c = jnp.dot(s, fold, preferred_element_type=jnp.float32) * inv_cnt   # (1, C)
        mean_l = jnp.dot(mean_c, bcast, preferred_element_type=jnp.float32)       # (1, L)
        d = acc - mean_l
        ss = jnp.sum(d * d, axis=0, keepdims=True)                            # (1, L)
        var_c = jnp.dot(ss, fold, preferred_element_type=jnp.float32) * inv_cnt
        scale_c = gamma * jax.lax.rsqrt(var_c + 1e-5)                         # (1, C)
        scale_l = jnp.dot(scale_c, bcast, preferred_element_type=jnp.float32)  # (1, L)
        beta_l = jnp.dot(beta, bcast, preferred_element_type=jnp.float32)      # (1, L)
        return jnp.maximum(d * scale_l + beta_l, 0.0)

    # Zero ONLY the two halo rows (full shared-scratch width, once); they are
    # never overwritten, so they stay zero for both conv blocks.
    zrow = jnp.zeros((N, 1, Wpad), cdtype)
    xpad_ref[:, 0:1, :] = zrow
    xpad_ref[:, H + 1:H + 2, :] = zrow

    # ---- block 1: conv3x3 -> BN -> ReLU ------------------------------------
    xpad_ref[:, 1:H + 1, :WCin] = x_ref[...].astype(cdtype)
    y1 = bn_relu(conv3x3(WCin, w1_ref), g1_ref[...], b1_ref[...], fold1, bcast1)

    # ---- block 2: conv3x3 -> BN -> ReLU (intermediate stays in VMEM; the
    # same halo scratch is reused — block-1's copy is dead at this point) ----
    xpad_ref[:, 1:H + 1, :WCmid] = y1.reshape(N, H, WCmid).astype(cdtype)
    y2 = bn_relu(conv3x3(WCmid, w2_ref), g2_ref[...], b2_ref[...], fold2, bcast2)

    out_ref[...] = y2            # (N*H, W*Cout): 128 dense lanes, unmasked vst


# ----------------------------- wrapper ---------------------------------------


def _pack_conv_weights(w_oihw, W, dtype):
    """OIHW (Cout, Cin, 3, 3) -> banded (3, W*Cin, W*Cout), cast to MXU dtype.

    band[ky, x_in*Cin + c, x_out*Cout + o] = w[o, c, ky, kx] with
    x_in = x_out + kx - 1; taps outside [0, W) are dropped = x zero padding.
    Each band entry holds a single weight (no sums), so casting the band to
    bf16 is exactly per-weight rounding.
    """
    KH, KW = int(w_oihw.shape[2]), int(w_oihw.shape[3])
    w = jnp.transpose(w_oihw, (2, 3, 1, 0)).astype(jnp.float32)  # (ky, kx, Cin, Cout)
    bands = []
    for ky in range(KH):
        b = None
        for kx in range(KW):
            shift = jnp.asarray(np.eye(W, W, k=1 - kx, dtype=np.float32))
            term = jnp.kron(shift, w[ky, kx])                    # (W*Cin, W*Cout)
            b = term if b is None else b + term
        bands.append(b)
    return jnp.stack(bands).astype(dtype)                        # (3, W*Cin, W*Cout)


@partial(jax.jit, static_argnames=("mxu_dtype",))
def double_conv_nhwc(x_nhwc, w1, g1, b1, w2, g2, b2, *, mxu_dtype=jnp.bfloat16):
    """DoubleConv forward, NHWC in / NHWC out (no layout transposes).

    x_nhwc: (N, H, W, Cin) -> (N, H, W, Cout), float32.
    mxu_dtype: dtype of the MXU operands (activations + banded weights).
      jnp.bfloat16 (default, MXU-native) or jnp.float32 (bit-for-bit module
      numerics).  Accumulation, BatchNorm and the output are always float32.
    """
    N, H, W, Cin = x_nhwc.shape
    Cmid, Cout = w1.shape[0], w2.shape[0]
    Cmax = max(Cin, Cmid)

    x = x_nhwc.astype(jnp.float32).reshape(N, H, W * Cin)   # lane-dense rows (free)
    band1 = _pack_conv_weights(w1, W, mxu_dtype)             # (3, W*Cin,  W*Cmid)
    band2 = _pack_conv_weights(w2, W, mxu_dtype)             # (3, W*Cmid, W*Cout)

    vmem = pl.BlockSpec(memory_space=pltpu.MemorySpace.VMEM)
    out2d = pl.pallas_call(
        double_conv_kernel,
        out_shape=jax.ShapeDtypeStruct((N * H, W * Cout), jnp.float32),
        in_specs=[vmem] * 7,
        out_specs=vmem,
        scratch_shapes=[
            pltpu.VMEM((N, H + 2, W * Cmax), mxu_dtype),    # shared H-halo scratch
        ],
        # No vmem_limit_bytes: the working set is a few hundred KiB, far under
        # the default scoped VMEM of every generation (v5e/v6e/v7x).
    )(x, band1,
      g1.reshape(1, Cmid).astype(jnp.float32), b1.reshape(1, Cmid).astype(jnp.float32),
      band2,
      g2.reshape(1, Cout).astype(jnp.float32), b2.reshape(1, Cout).astype(jnp.float32))

    return out2d.reshape(N, H, W, Cout)


def double_conv(x_nchw, w1, g1, b1, w2, g2, b2, *, mxu_dtype=jnp.bfloat16):
    """NCHW wrapper matching the PyTorch module interface.

    TODO(synk): in a full U-Net keep activations NHWC end-to-end and call
    double_conv_nhwc directly; each transpose here is an extra HBM pass.
    """
    x = jnp.transpose(x_nchw, (0, 2, 3, 1))
    y = double_conv_nhwc(x, w1, g1, b1, w2, g2, b2, mxu_dtype=mxu_dtype)
    return jnp.transpose(y, (0, 3, 1, 2))


# ----------------------------- reference & test -----------------------------


def _reference_double_conv(x_nchw, w1, g1, b1, w2, g2, b2,
                           conv_dtype=jnp.float32):
    """Pure-JAX reference (NHWC conv + training-mode BN + ReLU).

    conv_dtype quantizes the conv operands the same way the kernel's MXU path
    does (f32 accumulation and f32 BN in both cases).
    """
    def block(x, w_oihw, g, b):
        w_hwio = jnp.transpose(w_oihw, (2, 3, 1, 0))
        y = jax.lax.conv_general_dilated(
            x.astype(conv_dtype), w_hwio.astype(conv_dtype),
            window_strides=(1, 1), padding="SAME",
            dimension_numbers=("NHWC", "HWIO", "NHWC"),
            preferred_element_type=jnp.float32)
        mean = jnp.mean(y, axis=(0, 1, 2), keepdims=True)
        var = jnp.mean((y - mean) ** 2, axis=(0, 1, 2), keepdims=True)
        y = (y - mean) * jax.lax.rsqrt(var + 1e-5) * g + b
        return jnp.maximum(y, 0.0)

    x = jnp.transpose(x_nchw, (0, 2, 3, 1)).astype(jnp.float32)
    h = block(x, w1, g1, b1)
    o = block(h, w2, g2, b2)
    return jnp.transpose(o, (0, 3, 1, 2))


if __name__ == "__main__":
    # Module config: DoubleConv(in_channels=4, out_channels=8) -> mid_channels=8
    N, Cin, H, W = 2, 4, 16, 16
    Cmid, Cout = 8, 8

    key = jax.random.PRNGKey(0)
    k = jax.random.split(key, 7)
    x = jax.random.normal(k[0], (N, Cin, H, W), jnp.float32)

    # Deterministic synthetic parameters (shapes match nn.Conv2d / nn.BatchNorm2d).
    w1 = jax.random.normal(k[1], (Cmid, Cin, 3, 3), jnp.float32) * 0.2   # OIHW
    w2 = jax.random.normal(k[2], (Cout, Cmid, 3, 3), jnp.float32) * 0.2  # OIHW
    g1 = 1.0 + 0.1 * jax.random.normal(k[3], (Cmid,), jnp.float32)
    b1 = 0.1 * jax.random.normal(k[4], (Cmid,), jnp.float32)
    g2 = 1.0 + 0.1 * jax.random.normal(k[5], (Cout,), jnp.float32)
    b2 = 0.1 * jax.random.normal(k[6], (Cout,), jnp.float32)

    # bf16-MXU fast path (default): compare against a reference whose conv
    # operands are quantized to bf16 the same way (f32 accumulation + f32 BN).
    out = jax.block_until_ready(double_conv(x, w1, g1, b1, w2, g2, b2))
    assert out.shape == (N, Cout, H, W), out.shape
    ref_bf16 = jax.block_until_ready(
        _reference_double_conv(x, w1, g1, b1, w2, g2, b2,
                               conv_dtype=jnp.bfloat16))
    assert jnp.allclose(out, ref_bf16, rtol=5e-2, atol=5e-2), \
        f"bf16 path max abs err {jnp.max(jnp.abs(out - ref_bf16))}"

    # Strict-f32 path: reproduces the nn.Module's float32 forward numerics.
    out_f32 = jax.block_until_ready(
        double_conv(x, w1, g1, b1, w2, g2, b2, mxu_dtype=jnp.float32))
    ref_f32 = jax.block_until_ready(
        _reference_double_conv(x, w1, g1, b1, w2, g2, b2))
    assert jnp.allclose(out_f32, ref_f32, rtol=1e-4, atol=1e-4), \
        f"f32 path max abs err {jnp.max(jnp.abs(out_f32 - ref_f32))}"

    print("KERNEL_OK")
</pallas_src>

<mosaic_0001>
module attributes {stable_mosaic.version = 11 : i64} {
  func.func @double_conv_kernel(%arg0: memref<2x16x64xf32, #tpu.memory_space<vmem>>, %arg1: memref<3x64x128xbf16, #tpu.memory_space<vmem>>, %arg2: memref<1x8xf32, #tpu.memory_space<vmem>>, %arg3: memref<1x8xf32, #tpu.memory_space<vmem>>, %arg4: memref<3x128x128xbf16, #tpu.memory_space<vmem>>, %arg5: memref<1x8xf32, #tpu.memory_space<vmem>>, %arg6: memref<1x8xf32, #tpu.memory_space<vmem>>, %arg7: memref<32x128xf32, #tpu.memory_space<vmem>>, %arg8: memref<2x18x128xbf16, #tpu.memory_space<vmem>>) attributes {dimension_semantics = [], scalar_prefetch = 0 : i64, scratch_operands = 1 : i64, tpu.core_type = #tpu.core_type<tc>} {
    %0 = tpu.iota {dimensions = array<i32: 0>} : vector<128x8xi32>
    %c8_i32 = arith.constant 8 : i32
    %c0_i32 = arith.constant 0 : i32
    %1 = arith.cmpi eq, %c8_i32, %c0_i32 : i32
    %c1_i32 = arith.constant 1 : i32
    %2 = arith.select %1, %c1_i32, %c8_i32 : i32
    %3 = vector.broadcast %2 : i32 to vector<128x8xi32>
    %4 = arith.remsi %0, %3 : vector<128x8xi32>
    %c0_i32_0 = arith.constant 0 : i32
    %5 = vector.broadcast %c0_i32_0 : i32 to vector<128x8xi32>
    %6 = arith.cmpi ne, %4, %5 : vector<128x8xi32>
    %c0_i32_1 = arith.constant 0 : i32
    %7 = vector.broadcast %c0_i32_1 : i32 to vector<128x8xi32>
    %8 = arith.cmpi slt, %4, %7 : vector<128x8xi32>
    %c0_i32_2 = arith.constant 0 : i32
    %9 = arith.cmpi slt, %2, %c0_i32_2 : i32
    %10 = vector.broadcast %9 : i1 to vector<128x8xi1>
    %11 = vector.broadcast %10 : vector<128x8xi1> to vector<128x8xi1>
    %12 = arith.xori %8, %11 : vector<128x8xi1>
    %13 = arith.andi %12, %6 : vector<128x8xi1>
    %14 = vector.broadcast %2 : i32 to vector<128x8xi32>
    %15 = arith.addi %4, %14 : vector<128x8xi32>
    %16 = arith.select %13, %15, %4 : vector<128x8xi1>, vector<128x8xi32>
    %17 = tpu.iota {dimensions = array<i32: 1>} : vector<128x8xi32>
    %18 = arith.cmpi eq, %16, %17 : vector<128x8xi32>
    %19 = arith.extui %18 : vector<128x8xi1> to vector<128x8xi32>
    %20 = arith.sitofp %19 : vector<128x8xi32> to vector<128x8xf32>
    %21 = tpu.iota {dimensions = array<i32: 0>} : vector<8x128xi32>
    %22 = tpu.iota {dimensions = array<i32: 1>} : vector<8x128xi32>
    %c8_i32_3 = arith.constant 8 : i32
    %c0_i32_4 = arith.constant 0 : i32
    %23 = arith.cmpi eq, %c8_i32_3, %c0_i32_4 : i32
    %c1_i32_5 = arith.constant 1 : i32
    %24 = arith.select %23, %c1_i32_5, %c8_i32_3 : i32
    %25 = vector.broadcast %24 : i32 to vector<8x128xi32>
    %26 = arith.remsi %22, %25 : vector<8x128xi32>
    %c0_i32_6 = arith.constant 0 : i32
    %27 = vector.broadcast %c0_i32_6 : i32 to vector<8x128xi32>
    %28 = arith.cmpi ne, %26, %27 : vector<8x128xi32>
    %c0_i32_7 = arith.constant 0 : i32
    %29 = vector.broadcast %c0_i32_7 : i32 to vector<8x128xi32>
    %30 = arith.cmpi slt, %26, %29 : vector<8x128xi32>
    %c0_i32_8 = arith.constant 0 : i32
    %31 = arith.cmpi slt, %24, %c0_i32_8 : i32
    %32 = vector.broadcast %31 : i1 to vector<8x128xi1>
    %33 = vector.broadcast %32 : vector<8x128xi1> to vector<8x128xi1>
    %34 = arith.xori %30, %33 : vector<8x128xi1>
    %35 = arith.andi %34, %28 : vector<8x128xi1>
    %36 = vector.broadcast %24 : i32 to vector<8x128xi32>
    %37 = arith.addi %26, %36 : vector<8x128xi32>
    %38 = arith.select %35, %37, %26 : vector<8x128xi1>, vector<8x128xi32>
    %39 = arith.cmpi eq, %21, %38 : vector<8x128xi32>
    %40 = arith.extui %39 : vector<8x128xi1> to vector<8x128xi32>
    %41 = arith.sitofp %40 : vector<8x128xi32> to vector<8x128xf32>
    %cst = arith.constant 0.000000e+00 : bf16
    %42 = vector.broadcast %cst : bf16 to vector<2x1x128xbf16>
    %c0 = arith.constant 0 : index
    %c0_9 = arith.constant 0 : index
    %c0_10 = arith.constant 0 : index
    %43 = vector.load %arg8[%c0, %c0_9, %c0_10] : memref<2x18x128xbf16, #tpu.memory_space<vmem>>, vector<2x1x128xbf16>
    tpu.vector_store %arg8[%c0, %c0_9, %c0_10], %42 {strides = array<i32>} : memref<2x18x128xbf16, #tpu.memory_space<vmem>>, vector<2x1x128xbf16>,
    %c0_11 = arith.constant 0 : index
    %c17 = arith.constant 17 : index
    %c0_12 = arith.constant 0 : index
    %44 = vector.load %arg8[%c0_11, %c17, %c0_12] : memref<2x18x128xbf16, #tpu.memory_space<vmem>>, vector<2x1x128xbf16>
    tpu.vector_store %arg8[%c0_11, %c17, %c0_12], %42 {strides = array<i32>} : memref<2x18x128xbf16, #tpu.memory_space<vmem>>, vector<2x1x128xbf16>,
    %c0_13 = arith.constant 0 : index
    %c0_14 = arith.constant 0 : index
    %c0_15 = arith.constant 0 : index
    %45 = vector.load %arg0[%c0_13, %c0_14, %c0_15] : memref<2x16x64xf32, #tpu.memory_space<vmem>>, vector<2x16x64xf32>
    %46 = arith.truncf %45 : vector<2x16x64xf32> to vector<2x16x64xbf16>
    %c0_16 = arith.constant 0 : index
    %c1 = arith.constant 1 : index
    %c0_17 = arith.constant 0 : index
    %47 = vector.load %arg8[%c0_16, %c1, %c0_17] : memref<2x18x128xbf16, #tpu.memory_space<vmem>>, vector<2x16x64xbf16>
    tpu.vector_store %arg8[%c0_16, %c1, %c0_17], %46 {strides = array<i32>} : memref<2x18x128xbf16, #tpu.memory_space<vmem>>, vector<2x16x64xbf16>,
    %cst_18 = arith.constant 0.000000e+00 : f32
    %48 = vector.broadcast %cst_18 : f32 to vector<32x128xf32>
    %c0_19 = arith.constant 0 : index
    %c0_20 = arith.constant 0 : index
    %c0_21 = arith.constant 0 : index
    %49 = vector.load %arg8[%c0_19, %c0_20, %c0_21] : memref<2x18x128xbf16, #tpu.memory_space<vmem>>, vector<2x16x64xbf16>
    %50 = vector.shape_cast %49 : vector<2x16x64xbf16> to vector<32x64xbf16>
    %c0_22 = arith.constant 0 : index
    %c0_23 = arith.constant 0 : index
    %c0_24 = arith.constant 0 : index
    %51 = vector.load %arg1[%c0_22, %c0_23, %c0_24] : memref<3x64x128xbf16, #tpu.memory_space<vmem>>, vector<1x64x128xbf16>
    %52 = vector.shape_cast %51 : vector<1x64x128xbf16> to vector<64x128xbf16>
    %cst_25 = arith.constant dense<0.000000e+00> : vector<32x128xf32>
    %53 = tpu.matmul %50, %52, %cst_25 {dimension_numbers = #tpu.dot_dimension_numbers<[1], [0], [0], [1], [0, 0, 1, 1], [], []>} : vector<32x64xbf16>, vector<64x128xbf16>, vector<32x128xf32> -> vector<32x128xf32>
    %54 = arith.addf %48, %53 : vector<32x128xf32>
    %c0_26 = arith.constant 0 : index
    %c1_27 = arith.constant 1 : index
    %c0_28 = arith.constant 0 : index
    %55 = vector.load %arg8[%c0_26, %c1_27, %c0_28] : memref<2x18x128xbf16, #tpu.memory_space<vmem>>, vector<2x16x64xbf16>
    %56 = vector.shape_cast %55 : vector<2x16x64xbf16> to vector<32x64xbf16>
    %c1_29 = arith.constant 1 : index
    %c0_30 = arith.constant 0 : index
    %c0_31 = arith.constant 0 : index
    %57 = vector.load %arg1[%c1_29, %c0_30, %c0_31] : memref<3x64x128xbf16, #tpu.memory_space<vmem>>, vector<1x64x128xbf16>
    %58 = vector.shape_cast %57 : vector<1x64x128xbf16> to vector<64x128xbf16>
    %cst_32 = arith.constant dense<0.000000e+00> : vector<32x128xf32>
    %59 = tpu.matmul %56, %58, %cst_32 {dimension_numbers = #tpu.dot_dimension_numbers<[1], [0], [0], [1], [0, 0, 1, 1], [], []>} : vector<32x64xbf16>, vector<64x128xbf16>, vector<32x128xf32> -> vector<32x128xf32>
    %60 = arith.addf %54, %59 : vector<32x128xf32>
    %c0_33 = arith.constant 0 : index
    %c2 = arith.constant 2 : index
    %c0_34 = arith.constant 0 : index
    %61 = vector.load %arg8[%c0_33, %c2, %c0_34] : memref<2x18x128xbf16, #tpu.memory_space<vmem>>, vector<2x16x64xbf16>
    %62 = vector.shape_cast %61 : vector<2x16x64xbf16> to vector<32x64xbf16>
    %c2_35 = arith.constant 2 : index
    %c0_36 = arith.constant 0 : index
    %c0_37 = arith.constant 0 : index
    %63 = vector.load %arg1[%c2_35, %c0_36, %c0_37] : memref<3x64x128xbf16, #tpu.memory_space<vmem>>, vector<1x64x128xbf16>
    %64 = vector.shape_cast %63 : vector<1x64x128xbf16> to vector<64x128xbf16>
    %cst_38 = arith.constant dense<0.000000e+00> : vector<32x128xf32>
    %65 = tpu.matmul %62, %64, %cst_38 {dimension_numbers = #tpu.dot_dimension_numbers<[1], [0], [0], [1], [0, 0, 1, 1], [], []>} : vector<32x64xbf16>, vector<64x128xbf16>, vector<32x128xf32> -> vector<32x128xf32>
    %66 = arith.addf %60, %65 : vector<32x128xf32>
    %c0_39 = arith.constant 0 : index
    %c0_40 = arith.constant 0 : index
    %67 = vector.load %arg2[%c0_39, %c0_40] : memref<1x8xf32, #tpu.memory_space<vmem>>, vector<1x8xf32>
    %c0_41 = arith.constant 0 : index
    %c0_42 = arith.constant 0 : index
    %68 = vector.load %arg3[%c0_41, %c0_42] : memref<1x8xf32, #tpu.memory_space<vmem>>, vector<1x8xf32>
    %cst_43 = arith.constant dense<0.000000e+00> : vector<128xf32>
    %69 = vector.multi_reduction <add>, %66, %cst_43 [0] : vector<32x128xf32> to vector<128xf32>
    %70 = vector.shape_cast %69 : vector<128xf32> to vector<1x128xf32>
    %cst_44 = arith.constant dense<0.000000e+00> : vector<1x8xf32>
    %71 = tpu.matmul %70, %20, %cst_44 {dimension_numbers = #tpu.dot_dimension_numbers<[1], [0], [0], [1], [0, 0, 1, 1], [], []>} : vector<1x128xf32>, vector<128x8xf32>, vector<1x8xf32> -> vector<1x8xf32>
    %cst_45 = arith.constant 0.001953125 : f32
    %72 = vector.broadcast %cst_45 : f32 to vector<1x8xf32>
    %73 = arith.mulf %71, %72 : vector<1x8xf32>
    %cst_46 = arith.constant dense<0.000000e+00> : vector<1x128xf32>
    %74 = tpu.matmul %73, %41, %cst_46 {dimension_numbers = #tpu.dot_dimension_numbers<[1], [0], [0], [1], [0, 0, 1, 1], [], []>} : vector<1x8xf32>, vector<8x128xf32>, vector<1x128xf32> -> vector<1x128xf32>
    %75 = vector.broadcast %74 : vector<1x128xf32> to vector<32x128xf32>
    %76 = arith.subf %66, %75 : vector<32x128xf32>
    %77 = arith.mulf %76, %76 : vector<32x128xf32>
    %cst_47 = arith.constant dense<0.000000e+00> : vector<128xf32>
    %78 = vector.multi_reduction <add>, %77, %cst_47 [0] : vector<32x128xf32> to vector<128xf32>
    %79 = vector.shape_cast %78 : vector<128xf32> to vector<1x128xf32>
    %cst_48 = arith.constant dense<0.000000e+00> : vector<1x8xf32>
    %80 = tpu.matmul %79, %20, %cst_48 {dimension_numbers = #tpu.dot_dimension_numbers<[1], [0], [0], [1], [0, 0, 1, 1], [], []>} : vector<1x128xf32>, vector<128x8xf32>, vector<1x8xf32> -> vector<1x8xf32>
    %cst_49 = arith.constant 0.001953125 : f32
    %81 = vector.broadcast %cst_49 : f32 to vector<1x8xf32>
    %82 = arith.mulf %80, %81 : vector<1x8xf32>
    %cst_50 = arith.constant 9.99999974E-6 : f32
    %83 = vector.broadcast %cst_50 : f32 to vector<1x8xf32>
    %84 = arith.addf %82, %83 : vector<1x8xf32>
    %85 = math.rsqrt %84 : vector<1x8xf32>
    %86 = arith.mulf %67, %85 : vector<1x8xf32>
    %cst_51 = arith.constant dense<0.000000e+00> : vector<1x128xf32>
    %87 = tpu.matmul %86, %41, %cst_51 {dimension_numbers = #tpu.dot_dimension_numbers<[1], [0], [0], [1], [0, 0, 1, 1], [], []>} : vector<1x8xf32>, vector<8x128xf32>, vector<1x128xf32> -> vector<1x128xf32>
    %cst_52 = arith.constant dense<0.000000e+00> : vector<1x128xf32>
    %88 = tpu.matmul %68, %41, %cst_52 {dimension_numbers = #tpu.dot_dimension_numbers<[1], [0], [0], [1], [0, 0, 1, 1], [], []>} : vector<1x8xf32>, vector<8x128xf32>, vector<1x128xf32> -> vector<1x128xf32>
    %89 = vector.broadcast %87 : vector<1x128xf32> to vector<32x128xf32>
    %90 = arith.mulf %76, %89 : vector<32x128xf32>
    %91 = vector.broadcast %88 : vector<1x128xf32> to vector<32x128xf32>
    %92 = arith.addf %90, %91 : vector<32x128xf32>
    %cst_53 = arith.constant 0.000000e+00 : f32
    %93 = vector.broadcast %cst_53 : f32 to vector<32x128xf32>
    %94 = arith.maximumf %92, %93 : vector<32x128xf32>
    %95 = vector.shape_cast %94 : vector<32x128xf32> to vector<2x16x128xf32>
    %96 = arith.truncf %95 : vector<2x16x128xf32> to vector<2x16x128xbf16>
    %c0_54 = arith.constant 0 : index
    %c1_55 = arith.constant 1 : index
    %c0_56 = arith.constant 0 : index
    %97 = vector.load %arg8[%c0_54, %c1_55, %c0_56] : memref<2x18x128xbf16, #tpu.memory_space<vmem>>, vector<2x16x128xbf16>
    tpu.vector_store %arg8[%c0_54, %c1_55, %c0_56], %96 {strides = array<i32>} : memref<2x18x128xbf16, #tpu.memory_space<vmem>>, vector<2x16x128xbf16>,
    %cst_57 = arith.constant 0.000000e+00 : f32
    %98 = vector.broadcast %cst_57 : f32 to vector<32x128xf32>
    %c0_58 = arith.constant 0 : index
    %c0_59 = arith.constant 0 : index
    %c0_60 = arith.constant 0 : index
    %99 = vector.load %arg8[%c0_58, %c0_59, %c0_60] : memref<2x18x128xbf16, #tpu.memory_space<vmem>>, vector<2x16x128xbf16>
    %100 = vector.shape_cast %99 : vector<2x16x128xbf16> to vector<32x128xbf16>
    %c0_61 = arith.constant 0 : index
    %c0_62 = arith.constant 0 : index
    %c0_63 = arith.constant 0 : index
    %101 = vector.load %arg4[%c0_61, %c0_62, %c0_63] : memref<3x128x128xbf16, #tpu.memory_space<vmem>>, vector<1x128x128xbf16>
    %102 = vector.shape_cast %101 : vector<1x128x128xbf16> to vector<128x128xbf16>
    %cst_64 = arith.constant dense<0.000000e+00> : vector<32x128xf32>
    %103 = tpu.matmul %100, %102, %cst_64 {dimension_numbers = #tpu.dot_dimension_numbers<[1], [0], [0], [1], [0, 0, 1, 1], [], []>} : vector<32x128xbf16>, vector<128x128xbf16>, vector<32x128xf32> -> vector<32x128xf32>
    %104 = arith.addf %98, %103 : vector<32x128xf32>
    %c0_65 = arith.constant 0 : index
    %c1_66 = arith.constant 1 : index
    %c0_67 = arith.constant 0 : index
    %105 = vector.load %arg8[%c0_65, %c1_66, %c0_67] : memref<2x18x128xbf16, #tpu.memory_space<vmem>>, vector<2x16x128xbf16>
    %106 = vector.shape_cast %105 : vector<2x16x128xbf16> to vector<32x128xbf16>
    %c1_68 = arith.constant 1 : index
    %c0_69 = arith.constant 0 : index
    %c0_70 = arith.constant 0 : index
    %107 = vector.load %arg4[%c1_68, %c0_69, %c0_70] : memref<3x128x128xbf16, #tpu.memory_space<vmem>>, vector<1x128x128xbf16>
    %108 = vector.shape_cast %107 : vector<1x128x128xbf16> to vector<128x128xbf16>
    %cst_71 = arith.constant dense<0.000000e+00> : vector<32x128xf32>
    %109 = tpu.matmul %106, %108, %cst_71 {dimension_numbers = #tpu.dot_dimension_numbers<[1], [0], [0], [1], [0, 0, 1, 1], [], []>} : vector<32x128xbf16>, vector<128x128xbf16>, vector<32x128xf32> -> vector<32x128xf32>
    %110 = arith.addf %104, %109 : vector<32x128xf32>
    %c0_72 = arith.constant 0 : index
    %c2_73 = arith.constant 2 : index
    %c0_74 = arith.constant 0 : index
    %111 = vector.load %arg8[%c0_72, %c2_73, %c0_74] : memref<2x18x128xbf16, #tpu.memory_space<vmem>>, vector<2x16x128xbf16>
    %112 = vector.shape_cast %111 : vector<2x16x128xbf16> to vector<32x128xbf16>
    %c2_75 = arith.constant 2 : index
    %c0_76 = arith.constant 0 : index
    %c0_77 = arith.constant 0 : index
    %113 = vector.load %arg4[%c2_75, %c0_76, %c0_77] : memref<3x128x128xbf16, #tpu.memory_space<vmem>>, vector<1x128x128xbf16>
    %114 = vector.shape_cast %113 : vector<1x128x128xbf16> to vector<128x128xbf16>
    %cst_78 = arith.constant dense<0.000000e+00> : vector<32x128xf32>
    %115 = tpu.matmul %112, %114, %cst_78 {dimension_numbers = #tpu.dot_dimension_numbers<[1], [0], [0], [1], [0, 0, 1, 1], [], []>} : vector<32x128xbf16>, vector<128x128xbf16>, vector<32x128xf32> -> vector<32x128xf32>
    %116 = arith.addf %110, %115 : vector<32x128xf32>
    %c0_79 = arith.constant 0 : index
    %c0_80 = arith.constant 0 : index
    %117 = vector.load %arg5[%c0_79, %c0_80] : memref<1x8xf32, #tpu.memory_space<vmem>>, vector<1x8xf32>
    %c0_81 = arith.constant 0 : index
    %c0_82 = arith.constant 0 : index
    %118 = vector.load %arg6[%c0_81, %c0_82] : memref<1x8xf32, #tpu.memory_space<vmem>>, vector<1x8xf32>
    %cst_83 = arith.constant dense<0.000000e+00> : vector<128xf32>
    %119 = vector.multi_reduction <add>, %116, %cst_83 [0] : vector<32x128xf32> to vector<128xf32>
    %120 = vector.shape_cast %119 : vector<128xf32> to vector<1x128xf32>
    %cst_84 = arith.constant dense<0.000000e+00> : vector<1x8xf32>
    %121 = tpu.matmul %120, %20, %cst_84 {dimension_numbers = #tpu.dot_dimension_numbers<[1], [0], [0], [1], [0, 0, 1, 1], [], []>} : vector<1x128xf32>, vector<128x8xf32>, vector<1x8xf32> -> vector<1x8xf32>
    %cst_85 = arith.constant 0.001953125 : f32
    %122 = vector.broadcast %cst_85 : f32 to vector<1x8xf32>
    %123 = arith.mulf %121, %122 : vector<1x8xf32>
    %cst_86 = arith.constant dense<0.000000e+00> : vector<1x128xf32>
    %124 = tpu.matmul %123, %41, %cst_86 {dimension_numbers = #tpu.dot_dimension_numbers<[1], [0], [0], [1], [0, 0, 1, 1], [], []>} : vector<1x8xf32>, vector<8x128xf32>, vector<1x128xf32> -> vector<1x128xf32>
    %125 = vector.broadcast %124 : vector<1x128xf32> to vector<32x128xf32>
    %126 = arith.subf %116, %125 : vector<32x128xf32>
    %127 = arith.mulf %126, %126 : vector<32x128xf32>
    %cst_87 = arith.constant dense<0.000000e+00> : vector<128xf32>
    %128 = vector.multi_reduction <add>, %127, %cst_87 [0] : vector<32x128xf32> to vector<128xf32>
    %129 = vector.shape_cast %128 : vector<128xf32> to vector<1x128xf32>
    %cst_88 = arith.constant dense<0.000000e+00> : vector<1x8xf32>
    %130 = tpu.matmul %129, %20, %cst_88 {dimension_numbers = #tpu.dot_dimension_numbers<[1], [0], [0], [1], [0, 0, 1, 1], [], []>} : vector<1x128xf32>, vector<128x8xf32>, vector<1x8xf32> -> vector<1x8xf32>
    %cst_89 = arith.constant 0.001953125 : f32
    %131 = vector.broadcast %cst_89 : f32 to vector<1x8xf32>
    %132 = arith.mulf %130, %131 : vector<1x8xf32>
    %cst_90 = arith.constant 9.99999974E-6 : f32
    %133 = vector.broadcast %cst_90 : f32 to vector<1x8xf32>
    %134 = arith.addf %132, %133 : vector<1x8xf32>
    %135 = math.rsqrt %134 : vector<1x8xf32>
    %136 = arith.mulf %117, %135 : vector<1x8xf32>
    %cst_91 = arith.constant dense<0.000000e+00> : vector<1x128xf32>
    %137 = tpu.matmul %136, %41, %cst_91 {dimension_numbers = #tpu.dot_dimension_numbers<[1], [0], [0], [1], [0, 0, 1, 1], [], []>} : vector<1x8xf32>, vector<8x128xf32>, vector<1x128xf32> -> vector<1x128xf32>
    %cst_92 = arith.constant dense<0.000000e+00> : vector<1x128xf32>
    %138 = tpu.matmul %118, %41, %cst_92 {dimension_numbers = #tpu.dot_dimension_numbers<[1], [0], [0], [1], [0, 0, 1, 1], [], []>} : vector<1x8xf32>, vector<8x128xf32>, vector<1x128xf32> -> vector<1x128xf32>
    %139 = vector.broadcast %137 : vector<1x128xf32> to vector<32x128xf32>
    %140 = arith.mulf %126, %139 : vector<32x128xf32>
    %141 = vector.broadcast %138 : vector<1x128xf32> to vector<32x128xf32>
    %142 = arith.addf %140, %141 : vector<32x128xf32>
    %cst_93 = arith.constant 0.000000e+00 : f32
    %143 = vector.broadcast %cst_93 : f32 to vector<32x128xf32>
    %144 = arith.maximumf %142, %143 : vector<32x128xf32>
    %c0_94 = arith.constant 0 : index
    %c0_95 = arith.constant 0 : index
    %145 = vector.load %arg7[%c0_94, %c0_95] : memref<32x128xf32, #tpu.memory_space<vmem>>, vector<32x128xf32>
    tpu.vector_store %arg7[%c0_94, %c0_95], %144 {strides = array<i32>} : memref<32x128xf32, #tpu.memory_space<vmem>>, vector<32x128xf32>,
    return
  }
}

</mosaic_0001>

<bundles_post_ra>
// kernel: double_conv_nhwc.1
= control target key start
LH: loop header
LB: loop body
LE: loop exit
PB: predicated region body
PF: predicated region fallthrough
CT: control target
= control target key end

     0   :  { %vm302_vm0 = vsmask.f32 256  ;;  %v304_v5 = vld [vmem:[#allocation2] sm:$0x1]  ;;  %vm301_vm1 = vcmask 1040384   ;;  %v3572_v9 = vmov 0  ;;  %s3537_s1 = inlined_call_operand.vmem [shape: bf16[3,64,128], index: 1, kind: input, shape index: {}]   ;;  %s3538_s0 = inlined_call_operand.vmem [shape: f32[2,16,64], index: 0, kind: input, shape index: {}]   ;;  %s3539_s4 = inlined_call_operand.vmem [shape: bf16[3,128,128], index: 4, kind: input, shape index: {}]   ;;  %s3540_s2 = inlined_call_operand.vmem [shape: f32[1,8], index: 2, kind: input, shape index: {}]   ;;  %s3541_s3 = inlined_call_operand.vmem [shape: f32[1,8], index: 3, kind: input, shape index: {}]   ;;  %s3542_s5 = inlined_call_operand.vmem [shape: f32[1,8], index: 5, kind: input, shape index: {}]   ;;  %s3543_s6 = inlined_call_operand.vmem [shape: f32[1,8], index: 6, kind: input, shape index: {}]   ;;  %s3544_s7 = inlined_call_operand.vmem [shape: f32[32,128], index: 7, kind: output, shape index: {}]  }
   0x1   :  { %v2732_v0 = vld [vmem:[%s3537_s1 + $0x38] sm:$0xff]   ;;  %v2734_v2 = vld [vmem:[%s3537_s1 + $0x30] sm:$0xff]   ;;  %v2736_v4 = vld [vmem:[%s3537_s1 + $0x28] sm:$0xff]   ;;  %vm3545_vm3 = vsmask.f32 7938  ;;  %vm376_vm5 = vcmask 519168  }
   0x2   :  { %v2733_v1 = vld [vmem:[%s3537_s1 + $0x18] sm:$0xff]   ;;  %2463 = vmatprep.subr.bf16.mxu0 %v2732_v0  ;;  %v2735_v3 = vld [vmem:[%s3537_s1 + $0x10] sm:$0xff]   ;;  %v2737_v6 = vld [vmem:[%s3537_s1 + $0x8] sm:$0xff]   ;;  %vm334_vm6 = vsmask.f32 4368  ;;  %vm383_vm7 = vcmask 516096  }
   0x3   :  { %2464 = vmatpush3.bf16.msra.mxu0 %v2732_v0  ;;  %2475 = vmatprep.subr.bf16.mxu1 %v2733_v1  ;;  %v2738_v7 = vld [vmem:[%s3537_s1 + $0x20] sm:$0xff]   ;;  %vm2844_vm2 = vmand %vm301_vm1, %vm302_vm0  ;;  %v307_v10 = vld [vmem:[#allocation2 + $0xc] sm:$0x1]  ;;  %v3576_v36 = vmov 0  ;;  %vm499_vm11 = vcmask 523264   ;;  %vm650_vm12 = vcmask 1042432  }
   0x4   :  { %2476 = vmatpush3.bf16.msra.mxu1 %v2733_v1  ;;  %2465 = vmatprep.subr.bf16.mxu0 %v2734_v2  ;;  %v2739_v8 = vld [vmem:[%s3537_s1] sm:$0xff]   ;;  %v3573_v9 = vsel %vm2844_vm2, 4294967295, %v3572_v9  ;;  %v312_v11 = vld [vmem:[#allocation2 + $0x8] sm:$0x1]  ;;  %v305_v12 = vsel %vm2844_vm2, 0, %v304_v5  ;;  %v308_v13 = vsel %vm2844_vm2, 0, %v307_v10  ;;  %vm311_vm4 = vmand %vm301_vm1, %vm3545_vm3 }
   0x5   :  { %2477 = vmatprep.subr.bf16.mxu1 %v2735_v3  ;;  %v315_v14 = vld [vmem:[#allocation2 + $0x14] sm:$0x1]  ;;  %v318_v15 = vld [vmem:[%s3538_s0] sm:$0xff]  ;;  %306 = vst [vmem:[#allocation2] sm:$0x1] %v305_v12  ;;  %v313_v16 = vsel %vm311_vm4, 0, %v312_v11  ;;  %vm2872_vm8 = vmand %vm376_vm5, %vm3545_vm3 }
   0x6   :  { %309 = vst [vmem:[#allocation2 + $0xc] sm:$0x1] %v308_v13  ;;  %v316_v17 = vsel %vm311_vm4, 0, %v315_v14  ;;  %v319_v18 = vld [vmem:[%s3538_s0 + $0x8] sm:$0xff]  ;;  %v320_v19 = vld [vmem:[%s3538_s0 + $0x10] sm:$0xff]  ;;  %v321_v20 = vld [vmem:[%s3538_s0 + $0x18] sm:$0xff]  ;;  %v2327_v21 = vpack.c.bf16 %v318_v15, %v318_v15 }
   0x7   :  { %2466 = vmatpush3.bf16.msra.mxu0 %v2734_v2  ;;  %314 = vst [vmem:[#allocation2 + $0x8] sm:$0x1] %v313_v16  ;;  %317 = vst [vmem:[#allocation2 + $0x14] sm:$0x1] %v316_v17  ;;  %v2328_v22 = vpack.c.bf16 %v319_v18, %v319_v18  ;;  %v2329_v23 = vpack.c.bf16 %v320_v19, %v320_v19  ;;  %v2330_v24 = vpack.c.bf16 %v321_v20, %v321_v20  ;;  %v2868_v31 = vld [vmem:[%s3537_s1 + $0x58] sm:$0xff]   ;;  %vm651_vm15 = vcmask 1046532  }
   0x8   :  { %2478 = vmatpush3.bf16.msra.mxu1 %v2735_v3  ;;  %2467 = vmatprep.subr.bf16.mxu0 %v2736_v4  ;;  %v337_v25 = vshrl.u32 %v2327_v21, 16  ;;  %v340_v26 = vshll.u32 %v2327_v21, 16  ;;  %vm2878_vm9 = vmor %vm302_vm0, %vm334_vm6  ;;  %vm409_vm13 = vsmask.f32 3328  ;;  %vm410_vm14 = vsmask.f32 7440 }
   0x9   :  { %2479 = vmatprep.subr.bf16.mxu1 %v2737_v6  ;;  %v345_v27 = vshrl.u32 %v2328_v22, 16  ;;  %v348_v28 = vshll.u32 %v2328_v22, 16  ;;  %v354_v29 = vshrl.u32 %v2329_v23, 16  ;;  %v357_v30 = vshll.u32 %v2329_v23, 16  ;;  %vm2884_vm10 = vmand %vm383_vm7, %vm302_vm0 }
   0xa   :  { %v339_v32 = vrot.slane %v337_v25, 7  ;;  %v362_v33 = vshrl.u32 %v2330_v24, 16  ;;  %v365_v34 = vshll.u32 %v2330_v24, 16  ;;  %v3577_v36 = vsel %vm2878_vm9, 4294967295, %v3576_v36  ;;  %vm2911_vm0 = vmor %vm409_vm13, %vm410_vm14 }
   0xb   :  { %2468 = vmatpush3.bf16.msra.mxu0 %v2736_v4  ;;  %v347_v37 = vrot.slane %v345_v27, 7  ;;  %v356_v38 = vrot.slane %v354_v29, 7  ;;  %v3580_v19 = vmov 0  ;;  %vm2917_vm1 = vmor %vm650_vm12, %vm651_vm15  ;;  %vm3556_vm2 = vmmov 0  }
   0xc   :  { %2480 = vmatpush3.bf16.msra.mxu1 %v2737_v6  ;;  %2469 = vmatprep.subr.bf16.mxu0 %v2738_v7  ;;  %v342_v39 = vor.u32 %v340_v26, %v339_v32  ;;  %v343_v40 = vrot.slane %v339_v32, 4  ;;  %v364_v41 = vrot.slane %v362_v33, 7  ;;  %v378_v47 = vld [vmem:[#allocation2] sm:$0xf]  ;;  %v3581_v19 = vsel %vm2911_vm0, 4294967295, %v3580_v19 }
   0xd   :  { %2481 = vmatprep.subr.bf16.mxu1 %v2739_v8  ;;  %v350_v43 = vor.u32 %v348_v28, %v347_v37  ;;  %v352_v44 = vrot.slane %v347_v37, 4  ;;  %v359_v45 = vor.u32 %v357_v30, %v356_v38  ;;  %v360_v46 = vrot.slane %v356_v38, 4  ;;  %v388_v48 = vld [vmem:[#allocation2 + $0xc] sm:$0xf] }
   0xe   :  { %v367_v49 = vor.u32 %v365_v34, %v364_v41  ;;  %v369_v50 = vrot.slane %v364_v41, 4  ;;  %v379_v51 = vsel %vm2872_vm8, %v342_v39, %v378_v47  ;;  %v385_v52 = vld [vmem:[#allocation2 + $0x8] sm:$0x1]  ;;  %v392_v53 = vld [vmem:[#allocation2 + $0x14] sm:$0x1]  ;;  %v3582_v28 = vmov 0 }
   0xf   :  { %2470 = vmatpush3.bf16.msra.mxu0 %v2738_v7  ;;  %v351_v54 = vsel %vm2878_vm9, %v343_v40, %v350_v43  ;;  %380 = vst [vmem:[#allocation2] sm:$0xf] %v379_v51  ;;  %v386_v55 = vsel %vm2884_vm10, %v352_v44, %v385_v52  ;;  %v389_v56 = vsel %vm2872_vm8, %v359_v45, %v388_v48  ;;  %v3583_v28 = vsel %vm2917_vm1, 4294967295, %v3582_v28  ;;  %v2744_v52 = vld [vmem:[%s3537_s1 + $0x48] sm:$0xff]  }
  0x10   :  { %2482 = vmatpush3.bf16.msra.mxu1 %v2739_v8  ;;  %2487 = vmatprep.subr.bf16.mxu0 %v2868_v31  ;;  %v368_v57 = vsel %vm2878_vm9, %v360_v46, %v367_v49  ;;  %382 = vst.msk [vmem:[#allocation2 + $0x4] sm:$0xf] %vm376_vm5, %v351_v54  ;;  %387 = vst [vmem:[#allocation2 + $0x8] sm:$0x1] %v386_v55  ;;  %v393_v58 = vsel %vm2884_vm10, %v369_v50, %v392_v53  ;;  %v2743_v50 = vld [vmem:[%s3537_s1 + $0x50] sm:$0xff]  }
  0x11   :  { %390 = vst [vmem:[#allocation2 + $0xc] sm:$0xf] %v389_v56  ;;  %391 = vst.msk [vmem:[#allocation2 + $0x10] sm:$0xf] %vm376_vm5, %v368_v57  ;;  %v2745_v57 = vld [vmem:[%s3537_s1 + $0x40] sm:$0xff]  }
  0x12   :  { %394 = vst [vmem:[#allocation2 + $0x14] sm:$0x1] %v393_v58 }
  0x16   :  { %v2903_v59 = vld [vmem:[#allocation2] sm:$0xf] }
  0x17   :  { %v396_v60 = vld [vmem:[#allocation2 + $0x4] sm:$0xf]  ;;  %v407_v61 = vld [vmem:[#allocation2 + $0x8] sm:$0x1]  ;;  %v413_v62 = vshrl.u32 %v2903_v59, 16  ;;  %v416_v63 = vshll.u32 %v2903_v59, 16 }
  0x18   :  { %v422_v0 = vshll.u32 %v396_v60, 16  ;;  %v426_v1 = vshrl.u32 %v396_v60, 16  ;;  %v432_v2 = vshll.u32 %v407_v61, 16  ;;  %v397_v3 = vld [vmem:[#allocation2 + $0xc] sm:$0xf]  ;;  %v2157_v6 = vcombine.low %v2903_v59, %v396_v60 }
  0x19   :  { %v415_v4 = vrot.slane %v413_v62, 4  ;;  %v418_v5 = vrot.slane %v416_v63, 5  ;;  %v398_v7 = vld [vmem:[#allocation2 + $0x10] sm:$0xf]  ;;  %v408_v8 = vld [vmem:[#allocation2 + $0x14] sm:$0x1] }
  0x1a   :  { %v424_v10 = vrot.slane %v422_v0, 5  ;;  %v428_v11 = vrot.slane %v426_v1, 4  ;;  %v434_v12 = vrot.slane %v432_v2, 5  ;;  %v437_v13 = vshrl.u32 %v397_v3, 16  ;;  %2483 = vmatprep.mubr.msk.bf16.mxu1 %vm499_vm11, %v2157_v6  ;;  %v644_v18 = vld [vmem:[#allocation2] sm:$0xe] }
  0x1b   :  { %v419_v14 = vor.u32 %v418_v5, %v415_v4  ;;  %v440_v15 = vshll.u32 %v397_v3, 16  ;;  %v446_v16 = vshll.u32 %v398_v7, 16  ;;  %v450_v17 = vshrl.u32 %v398_v7, 16  ;;  %v645_v53 = vld [vmem:[#allocation2 + $0xc] sm:$0xe] }
  0x1c   :  { %v429_v20 = vor.u32 %v428_v11, %v424_v10  ;;  %v439_v21 = vrot.slane %v437_v13, 4  ;;  %v456_v22 = vshll.u32 %v408_v8, 16  ;;  %v2158_v23 = vcombine.low %v397_v3, %v398_v7 }
  0x1d   :  { %v420_v24 = vrot.slane %v419_v14, 4  ;;  %v442_v25 = vrot.slane %v440_v15, 5  ;;  %v448_v26 = vrot.slane %v446_v16, 5  ;;  %v452_v27 = vrot.slane %v450_v17, 4 }
  0x1e   :  { %v430_v29 = vrot.slane %v429_v20, 4  ;;  %v658_v30 = vrot.slane %v407_v61, 5  ;;  %2484 = vmatmul.mubr.msk.bf16.vlgmr.msra.gmra.mxu1 %vm499_vm11, %v2158_v23  ;;  %v2165_v32 = vrot.slane %v644_v18, 9  ;;  %v655_v33 = vrot.slane %v396_v60, 5 }
  0x1f   :  { %v425_v34 = vsel %vm2911_vm0, %v420_v24, %v424_v10  ;;  %v443_v35 = vor.u32 %v442_v25, %v439_v21  ;;  %v453_v37 = vor.u32 %v452_v27, %v448_v26  ;;  %v458_v38 = vrot.slane %v456_v22, 5 }
  0x20   :  { %v435_v39 = vsel %vm2911_vm0, %v430_v29, %v434_v12  ;;  %v656_v40 = vsel %vm2917_vm1, %v2165_v32, %v655_v33  ;;  %v657_v41 = vrot.slane %v655_v33, 4  ;;  %v662_v51 = vrot.slane %v398_v7, 5 }
  0x21   :  { %v2149_v42 = vcombine.low %v425_v34, %v435_v39  ;;  %v444_v43 = vrot.slane %v443_v35, 4  ;;  %v454_v44 = vrot.slane %v453_v37, 4  ;;  %v2166_v54 = vrot.slane %v645_v53, 9 }
  0x22   :  { %v659_v45 = vsel %vm2917_vm1, %v657_v41, %v658_v30  ;;  %v664_v55 = vrot.slane %v662_v51, 4  ;;  %v665_v56 = vrot.slane %v408_v8, 5  ;;  %v27_v61 = vlaneseq }
  0x23   :  { %2471 = vmatprep.mubr.msk.bf16.mxu0 %vm499_vm11, %v2149_v42  ;;  %v449_v46 = vsel %vm2911_vm0, %v444_v43, %v448_v26  ;;  %v459_v47 = vsel %vm2911_vm0, %v454_v44, %v458_v38  ;;  %v2175_v48 = vcombine.low %v656_v40, %v659_v45  ;;  %v2776_v1 = vmov 0.0  }
  0x24   :  { %v2150_v49 = vcombine.low %v449_v46, %v459_v47  ;;  %v666_v58 = vsel %vm2917_vm1, %v664_v55, %v665_v56  ;;  %v2952_v62 = vshrl.u32 %v27_v61, 7  ;;  %v2955_v0 = vand.u32 127, %v27_v61  ;;  %2499 = vmatprep.subr.mxu1 %v2776_v1  ;;  %2531 = vmatprep.mubr.msk.f32.mxu1 %vm3556_vm2, %v2776_v1 }
  0x25   :  { %v2777_v7 = vmov 1.0   ;;  %v3604_v40 = vmov 0  ;;  %v3606_v43 = vmov 0  ;;  %v3608_v46 = vmov 0 }
  0x26   :  { %2472 = vmatmul.mubr.msk.bf16.vlgmr.msra.gmra.mxu0 %vm499_vm11, %v2150_v49  ;;  %v43_v63 = vadd.s32 120, %v2952_v62  ;;  %v42_v2 = vadd.s32 112, %v2952_v62  ;;  %v41_v6 = vadd.s32 104, %v2952_v62  ;;  %v40_v11 = vadd.s32 96, %v2952_v62 }
  0x27   :  { %2488 = vmatpush3.bf16.msra.mxu0 %v2868_v31  ;;  %2495 = vmatprep.mubr.msk.bf16.mxu0 %vm499_vm11, %v2175_v48  ;;  %v663_v31 = vsel %vm2917_vm1, %v2166_v54, %v662_v51  ;;  %v39_v14 = vadd.s32 88, %v2952_v62  ;;  %v38_v17 = vadd.s32 80, %v2952_v62  ;;  %v37_v21 = vadd.s32 72, %v2952_v62 }
  0x28   :  { %2489 = vmatprep.subr.bf16.mxu0 %v2743_v50  ;;  %v2176_v60 = vcombine.low %v663_v31, %v666_v58  ;;  %v153_v3 = vand.u32 7, %v43_v63  ;;  %v146_v4 = vand.u32 7, %v42_v2  ;;  %v139_v10 = vand.u32 7, %v41_v6 }
  0x29   :  { %v132_v13 = vand.u32 7, %v40_v11  ;;  %v125_v16 = vand.u32 7, %v39_v14  ;;  %v118_v20 = vand.u32 7, %v38_v17  ;;  %v111_v23 = vand.u32 7, %v37_v21 }
  0x2a   :  { %vm2961_vm4 = vcmp.eq.s32.totalorder %v153_v3, %v2955_v0  ;;  %vm2970_vm5 = vcmp.eq.s32.totalorder %v146_v4, %v2955_v0  ;;  %vm2981_vm6 = vcmp.eq.s32.totalorder %v139_v10, %v2955_v0  ;;  %v36_v24 = vadd.s32 64, %v2952_v62 }
  0x2b   :  { %2490 = vmatpush3.bf16.msra.mxu0 %v2743_v50  ;;  %2500 = vmatpush3.msk.msra.mxu1 %vm2961_vm4, %v2777_v7  ;;  %vm2991_vm7 = vcmp.eq.s32.totalorder %v132_v13, %v2955_v0  ;;  %vm3001_vm8 = vcmp.eq.s32.totalorder %v125_v16, %v2955_v0  ;;  %vm3011_vm10 = vcmp.eq.s32.totalorder %v118_v20, %v2955_v0  ;;  %v35_v27 = vadd.s32 56, %v2952_v62 }
  0x2c   :  { %2491 = vmatprep.subr.bf16.mxu0 %v2744_v52  ;;  %2501 = vmatprep.subr.mxu1 %v2776_v1  ;;  %v104_v26 = vand.u32 7, %v36_v24  ;;  %v34_v32 = vadd.s32 48, %v2952_v62  ;;  %v33_v35 = vadd.s32 40, %v2952_v62  ;;  %v32_v39 = vadd.s32 32, %v2952_v62 }
  0x2d   :  { %2502 = vmatpush3.msk.msra.mxu1 %vm2970_vm5, %v2777_v7  ;;  %v97_v30 = vand.u32 7, %v35_v27  ;;  %v31_v42 = vadd.s32 24, %v2952_v62  ;;  %v30_v45 = vadd.s32 16, %v2952_v62  ;;  %v29_v48 = vadd.s32 8, %v2952_v62 }
  0x2e   :  { %2503 = vmatprep.subr.mxu1 %v2776_v1  ;;  %vm3031_vm12 = vcmp.eq.s32.totalorder %v104_v26, %v2955_v0  ;;  %v90_v34 = vand.u32 7, %v34_v32  ;;  %v83_v38 = vand.u32 7, %v33_v35  ;;  %v76_v41 = vand.u32 7, %v32_v39 }
  0x2f   :  { %2492 = vmatpush3.bf16.msra.mxu0 %v2744_v52  ;;  %2504 = vmatpush3.msk.msra.mxu1 %vm2981_vm6, %v2777_v7  ;;  %vm3041_vm13 = vcmp.eq.s32.totalorder %v97_v30, %v2955_v0  ;;  %v69_v44 = vand.u32 7, %v31_v42  ;;  %v62_v47 = vand.u32 7, %v30_v45  ;;  %v48_v49 = vand.u32 7, %v2952_v62 }
  0x30   :  { %2493 = vmatprep.subr.bf16.mxu0 %v2745_v57  ;;  %2505 = vmatprep.subr.mxu1 %v2776_v1  ;;  %vm3051_vm14 = vcmp.eq.s32.totalorder %v90_v34, %v2955_v0  ;;  %vm3061_vm15 = vcmp.eq.s32.totalorder %v83_v38, %v2955_v0  ;;  %vm3071_vm3 = vcmp.eq.s32.totalorder %v76_v41, %v2955_v0  ;;  %v3610_v50 = vmov 0 }
  0x31   :  { %2506 = vmatpush3.msk.msra.mxu1 %vm2991_vm7, %v2777_v7  ;;  %v3605_v40 = vsel %vm3061_vm15, 4294967295, %v3604_v40  ;;  %v3607_v43 = vsel %vm3071_vm3, 4294967295, %v3606_v43  ;;  %vm3081_vm1 = vcmp.eq.s32.totalorder %v69_v44, %v2955_v0  ;;  %vm3092_vm0 = vcmp.eq.s32.totalorder %v62_v47, %v2955_v0 }
  0x32   :  { %2507 = vmatprep.subr.mxu1 %v2776_v1  ;;  %v3609_v46 = vsel %vm3081_vm1, 4294967295, %v3608_v46  ;;  %v3611_v50 = vsel %vm3092_vm0, 4294967295, %v3610_v50  ;;  %v55_v51 = vand.u32 7, %v29_v48  ;;  %v3612_v52 = vmov 0 }
  0x33   :  { %2494 = vmatpush3.bf16.msra.mxu0 %v2745_v57  ;;  %2508 = vmatpush3.msk.msra.mxu1 %vm3001_vm8, %v2777_v7  ;;  %v3614_v53 = vmov 0  ;;  %v290_v54 = vand.u32 7, %v2955_v0  ;;  %v3616_v55 = vmov 0  ;;  %v3205_v44 = vsub.s32 0, %v2952_v62 }
  0x34   :  { %2534 = vmatprep.subr.mxu0 %v2776_v1  ;;  %2509 = vmatprep.subr.mxu1 %v2776_v1  ;;  %vm3105_vm9 = vcmp.eq.s32.totalorder %v55_v51, %v2955_v0 }
  0x35   :  { %2510 = vmatpush3.msk.msra.mxu1 %vm3011_vm10, %v2777_v7  ;;  %v3613_v52 = vsel %vm3105_vm9, 4294967295, %v3612_v52 }
  0x36   :  { %2496 = vmatmul.mubr.msk.bf16.vlgmr.msra.gmra.mxu0 %vm499_vm11, %v2176_v60  ;;  %2511 = vmatprep.subr.mxu1 %v2776_v1  ;;  %vm3021_vm11 = vcmp.eq.s32.totalorder %v111_v23, %v2955_v0 }
  0x37   :  { %2512 = vmatpush3.msk.msra.mxu1 %vm3021_vm11, %v2777_v7  ;;  %2536 = vmatprep.mubr.msk.f32.mxu0 %vm3556_vm2, %v2776_v1  ;;  %vm3124_vm2 = vcmp.eq.s32.totalorder %v2952_v62, %v290_v54 }
  0x38   :  { %2513 = vmatprep.subr.mxu1 %v2776_v1  ;;  %v3617_v55 = vsel %vm3124_vm2, 4294967295, %v3616_v55  ;;  %2535 = vmatpush3.msk.msra.mxu0 %vm3124_vm2, %v2777_v7 }
  0x39   :  { %2514 = vmatpush3.msk.msra.mxu1 %vm3031_vm12, %v2777_v7  ;;  %2539 = vmatprep.subr.mxu0 %v2776_v1 }
  0x3a   :  { %2515 = vmatprep.subr.mxu1 %v2776_v1 }
  0x3b   :  { %2516 = vmatpush3.msk.msra.mxu1 %vm3041_vm13, %v2777_v7 }
  0x3c   :  { %2517 = vmatprep.subr.mxu1 %v2776_v1 }
  0x3d   :  { %2518 = vmatpush3.msk.msra.mxu1 %vm3051_vm14, %v2777_v7 }
  0x3e   :  { %2519 = vmatprep.subr.mxu1 %v2776_v1 }
  0x3f   :  { %2520 = vmatpush3.msk.msra.mxu1 %vm3061_vm15, %v2777_v7 }
  0x40   :  { %2521 = vmatprep.subr.mxu1 %v2776_v1 }
  0x41   :  { %2522 = vmatpush3.msk.msra.mxu1 %vm3071_vm3, %v2777_v7 }
  0x42   :  { %2523 = vmatprep.subr.mxu1 %v2776_v1 }
  0x43   :  { %2524 = vmatpush3.msk.msra.mxu1 %vm3081_vm1, %v2777_v7  ;;  %vm3110_vm1 = vcmp.eq.s32.totalorder %v48_v49, %v2955_v0 }
  0x44   :  { %2525 = vmatprep.subr.mxu1 %v2776_v1  ;;  %v3615_v53 = vsel %vm3110_vm1, 4294967295, %v3614_v53 }
  0x45   :  { %2526 = vmatpush3.msk.msra.mxu1 %vm3092_vm0, %v2777_v7 }
  0x46   :  { %2527 = vmatprep.subr.mxu1 %v2776_v1 }
  0x47   :  { %2528 = vmatpush3.msk.msra.mxu1 %vm3105_vm9, %v2777_v7  ;;  %vm3562_vm9 = vcmask 64512  }
  0x48   :  { %2529 = vmatprep.subr.mxu1 %v2776_v1 }
  0x49   :  { %2530 = vmatpush3.msk.msra.mxu1 %vm3110_vm1, %v2777_v7  ;;  %vm3618_vm1 = vmmov 0  }
  0x4a   :  { %2574 = vmatprep.subr.mxu1 %v2776_v1 }
  0xde   :  { %v2485_v57 = vpop.f32.mrf.mxu1 }
  0xe0   :  { %v629_v58 = vpop.f32.mrf.mxu1 }
  0xe2   :  { %v2486_v61 = vpop.f32.mrf.mxu1 }
  0xe4   :  { %v632_v2 = vpop.f32.mrf.mxu1 }
  0xe6   :  { %v2473_v56 = vpop.f32.mrf.mxu0 }
  0xe7   :  { %v638_v13 = vadd.f32 %v2485_v57, %v2473_v56 }
  0xe8   :  { %v540_v31 = vpop.f32.mrf.mxu0 }
  0xe9   :  { %v630_v6 = vadd.f32 %v629_v58, %v540_v31 }
  0xea   :  { %v2474_v60 = vpop.f32.mrf.mxu0 }
  0xeb   :  { %v641_v17 = vadd.f32 %v2486_v61, %v2474_v60 }
  0xec   :  { %v543_v63 = vpop.f32.mrf.mxu0 }
  0xed   :  { %v633_v10 = vadd.f32 %v632_v2, %v543_v63 }
  0xf6   :  { %v2497_v0 = vpop.f32.mrf.mxu0 }
  0xf7   :  { %v763_v20 = vadd.f32 %v2497_v0, %v638_v13 }
  0xf8   :  { %v746_v3 = vpop.f32.mrf.mxu0 }
  0xf9   :  { %v761_v14 = vadd.f32 %v746_v3, %v630_v6 }
  0xfa   :  { %v2498_v4 = vpop.f32.mrf.mxu0 }
  0xfb   :  { %v764_v23 = vadd.f32 %v2498_v4, %v641_v17 }
  0xfc   :  { %v749_v11 = vpop.f32.mrf.mxu0 }
  0xfd   :  { %v762_v16 = vadd.f32 %v749_v11, %v633_v10  ;;  %v2746_v11 = vld [vmem:[%s3539_s4 + $0x38] sm:$0xff]  }
  0xff   :  { %v767_v21 = vadd.f32 %v762_v16, %v761_v14 }
 0x101   :  { %v768_v24 = vadd.f32 %v767_v21, %v763_v20 }
 0x103   :  { %v769_v26 = vadd.f32 %v768_v24, %v764_v23  ;;  %v766_v24 = vld [vmem:[%s3541_s3] sm:$0x1] }
 0x105   :  { %v770_v27 = vrot.slane %v769_v26, 4 }
 0x107   :  { %v771_v30 = vadd.f32 %v770_v27, %v769_v26  ;;  %v2747_v26 = vld [vmem:[%s3539_s4 + $0x30] sm:$0xff]   ;;  %v2748_v27 = vld [vmem:[%s3539_s4 + $0x78] sm:$0xff]  }
 0x109   :  { %v772_v32 = vrot.slane %v771_v30, 2 }
 0x10b   :  { %v773_v34 = vadd.f32 %v772_v32, %v771_v30  ;;  %v2749_v30 = vld [vmem:[%s3539_s4 + $0x28] sm:$0xff]   ;;  %v2750_v32 = vld [vmem:[%s3539_s4 + $0x70] sm:$0xff]  }
 0x10d   :  { %v774_v35 = vrot.slane %v773_v34, 1 }
 0x10f   :  { %v775_v38 = vadd.f32 %v774_v35, %v773_v34  ;;  %v2751_v34 = vld [vmem:[%s3539_s4 + $0x20] sm:$0xff]   ;;  %v2752_v35 = vld [vmem:[%s3539_s4 + $0x68] sm:$0xff]  }
 0x111   :  { %2532 = vmatmul.mubr.f32.vlgmr.msra.gmra.mxu1 %v775_v38  ;;  %v2753_v38 = vld [vmem:[%s3539_s4 + $0x18] sm:$0xff]  }
 0x112   :  { %2575 = vmatpush3.msk.msra.mxu1 %vm3124_vm2, %v2777_v7  ;;  %2576 = vmatprep.mubr.msk.f32.mxu1 %vm3618_vm1, %v2776_v1 }
 0x113   :  { %2579 = vmatprep.subr.mxu1 %v2776_v1 }
 0x1d1   :  { %v842_v39 = vpop.f32.mrf.mxu1 }
 0x1d2   :  { %v846_v41 = vmul.f32 0.001953125, %v842_v39  ;;  %v2754_v39 = vld [vmem:[%s3539_s4 + $0x60] sm:$0xff]  }
 0x1d3   :  { %v2533_v42 = vpop.f32.mrf.mxu1 }
 0x1d4   :  { %2537 = vmatmul.mubr.msk.f32.vlgmr.msra.gmra.mxu0 %vm3562_vm9, %v846_v41  ;;  %vm3619_vm9 = vnez %v3609_v46  ;;  %v2755_v41 = vld [vmem:[%s3539_s4 + $0x10] sm:$0xff]   ;;  %v2756_v42 = vld [vmem:[%s3539_s4 + $0x58] sm:$0xff]  }
 0x1d5   :  { %2540 = vmatpush3.msk.msra.mxu0 %vm2961_vm4, %v2777_v7  ;;  %2571 = vmatprep.mubr.msk.f32.mxu0 %vm3618_vm1, %v2776_v1 }
 0x1d6   :  { %2541 = vmatprep.subr.mxu0 %v2776_v1 }
 0x1d7   :  { %2542 = vmatpush3.msk.msra.mxu0 %vm2970_vm5, %v2777_v7 }
 0x1d8   :  { %2543 = vmatprep.subr.mxu0 %v2776_v1 }
 0x1d9   :  { %2544 = vmatpush3.msk.msra.mxu0 %vm2981_vm6, %v2777_v7 }
 0x1da   :  { %2545 = vmatprep.subr.mxu0 %v2776_v1 }
 0x1db   :  { %2546 = vmatpush3.msk.msra.mxu0 %vm2991_vm7, %v2777_v7 }
 0x1dc   :  { %2547 = vmatprep.subr.mxu0 %v2776_v1 }
 0x1dd   :  { %2548 = vmatpush3.msk.msra.mxu0 %vm3001_vm8, %v2777_v7 }
 0x1de   :  { %2549 = vmatprep.subr.mxu0 %v2776_v1 }
 0x1df   :  { %2550 = vmatpush3.msk.msra.mxu0 %vm3011_vm10, %v2777_v7 }
 0x1e0   :  { %2551 = vmatprep.subr.mxu0 %v2776_v1 }
 0x1e1   :  { %2552 = vmatpush3.msk.msra.mxu0 %vm3021_vm11, %v2777_v7 }
 0x1e2   :  { %2553 = vmatprep.subr.mxu0 %v2776_v1 }
 0x1e3   :  { %2554 = vmatpush3.msk.msra.mxu0 %vm3031_vm12, %v2777_v7 }
 0x1e4   :  { %2555 = vmatprep.subr.mxu0 %v2776_v1 }
 0x1e5   :  { %2556 = vmatpush3.msk.msra.mxu0 %vm3041_vm13, %v2777_v7 }
 0x1e6   :  { %2557 = vmatprep.subr.mxu0 %v2776_v1 }
 0x1e7   :  { %2558 = vmatpush3.msk.msra.mxu0 %vm3051_vm14, %v2777_v7 }
 0x1e8   :  { %2559 = vmatprep.subr.mxu0 %v2776_v1 }
 0x1e9   :  { %2560 = vmatpush3.msk.msra.mxu0 %vm3061_vm15, %v2777_v7  ;;  %vm3620_vm15 = vnez %v3613_v52 }
 0x1ea   :  { %2561 = vmatprep.subr.mxu0 %v2776_v1 }
 0x1eb   :  { %2562 = vmatpush3.msk.msra.mxu0 %vm3071_vm3, %v2777_v7  ;;  %vm3621_vm3 = vnez %v3615_v53 }
 0x1ec   :  { %2563 = vmatprep.subr.mxu0 %v2776_v1 }
 0x1ed   :  { %2564 = vmatpush3.msk.msra.mxu0 %vm3619_vm9, %v2777_v7 }
 0x1ee   :  { %2565 = vmatprep.subr.mxu0 %v2776_v1 }
 0x1ef   :  { %2566 = vmatpush3.msk.msra.mxu0 %vm3092_vm0, %v2777_v7  ;;  %vm3627_vm0 = vnez %v3577_v36 }
 0x1f0   :  { %2567 = vmatprep.subr.mxu0 %v2776_v1 }
 0x1f1   :  { %2568 = vmatpush3.msk.msra.mxu0 %vm3620_vm15, %v2777_v7 }
 0x1f2   :  { %2569 = vmatprep.subr.mxu0 %v2776_v1 }
 0x1f3   :  { %2570 = vmatpush3.msk.msra.mxu0 %vm3621_vm3, %v2777_v7  ;;  %vm3622_vm3 = vcmask 64512  }
 0x1f4   :  { %2604 = vmatprep.subr.bf16.mxu0 %v2746_v11  ;;  %vm3623_vm15 = vmmov %vm3622_vm3 }
 0x294   :  { %v917_v45 = vpop.f32.mrf.mxu0 }
 0x295   :  { %v924_v47 = vrot.slane %v917_v45, %v3205_v44  ;;  %v2757_v45 = vld [vmem:[%s3539_s4 + $0x8] sm:$0xff]  }
 0x296   :  { %v2538_v48 = vpop.f32.mrf.mxu0 }
 0x297   :  { %v3208_v49 = vsub.f32 %v761_v14, %v924_v47  ;;  %v3210_v51 = vsub.f32 %v762_v16, %v924_v47  ;;  %v3212_v54 = vsub.f32 %v763_v20, %v924_v47  ;;  %v3214_v56 = vsub.f32 %v764_v23, %v924_v47  ;;  %v765_v20 = vld [vmem:[%s3540_s2] sm:$0x1]  ;;  %v2758_v47 = vld [vmem:[%s3539_s4 + $0x50] sm:$0xff]  }
 0x298   :  { %v2759_v48 = vld [vmem:[%s3539_s4] sm:$0xff]  }
 0x299   :  { %v929_v57 = vmul.f32 %v3208_v49, %v3208_v49  ;;  %v930_v31 = vmul.f32 %v3210_v51, %v3210_v51  ;;  %v931_v62 = vmul.f32 %v3212_v54, %v3212_v54  ;;  %v932_v60 = vmul.f32 %v3214_v56, %v3214_v56 }
 0x29b   :  { %v933_v58 = vadd.f32 %v930_v31, %v929_v57  ;;  %v2761_v57 = vld [vmem:[%s3539_s4 + $0x48] sm:$0xff]   ;;  %v2763_v31 = vld [vmem:[%s3539_s4 + $0x40] sm:$0xff]  }
 0x29d   :  { %v934_v61 = vadd.f32 %v933_v58, %v931_v62  ;;  %v3289_v62 = vld [vmem:[%s3539_s4 + $0xb8] sm:$0xff]  }
 0x29f   :  { %v935_v63 = vadd.f32 %v934_v61, %v932_v60 }
 0x2a1   :  { %v936_v0 = vrot.slane %v935_v63, 4 }
 0x2a3   :  { %v937_v2 = vadd.f32 %v936_v0, %v935_v63 }
 0x2a5   :  { %v938_v3 = vrot.slane %v937_v2, 2 }
 0x2a7   :  { %v939_v4 = vadd.f32 %v938_v3, %v937_v2 }
 0x2a9   :  { %v940_v6 = vrot.slane %v939_v4, 1 }
 0x2ab   :  { %v941_v10 = vadd.f32 %v940_v6, %v939_v4 }
 0x2ad   :  { %2572 = vmatmul.mubr.f32.vlgmr.msra.gmra.mxu0 %v941_v10 }
 0x2ae   :  { %2605 = vmatpush3.bf16.msra.mxu0 %v2746_v11 }
 0x2af   :  { %2606 = vmatprep.subr.bf16.mxu0 %v2747_v26 }
 0x2b2   :  { %2607 = vmatpush3.bf16.msra.mxu0 %v2747_v26 }
 0x2b3   :  { %2608 = vmatprep.subr.bf16.mxu0 %v2749_v30 }
 0x2b6   :  { %2609 = vmatpush3.bf16.msra.mxu0 %v2749_v30 }
 0x2b7   :  { %2610 = vmatprep.subr.bf16.mxu0 %v2751_v34 }
 0x2ba   :  { %2611 = vmatpush3.bf16.msra.mxu0 %v2751_v34 }
 0x2bb   :  { %2612 = vmatprep.subr.bf16.mxu0 %v2753_v38 }
 0x2be   :  { %2613 = vmatpush3.bf16.msra.mxu0 %v2753_v38 }
 0x2bf   :  { %2614 = vmatprep.subr.bf16.mxu0 %v2755_v41 }
 0x2c2   :  { %2615 = vmatpush3.bf16.msra.mxu0 %v2755_v41 }
 0x2c3   :  { %2616 = vmatprep.subr.bf16.mxu0 %v2757_v45 }
 0x2c6   :  { %2617 = vmatpush3.bf16.msra.mxu0 %v2757_v45 }
 0x2c7   :  { %2618 = vmatprep.subr.bf16.mxu0 %v2759_v48 }
 0x2ca   :  { %2619 = vmatpush3.bf16.msra.mxu0 %v2759_v48  ;;  %v1239_v48 = vld [vmem:[#allocation2 + $0x8] sm:$0x1] }
 0x2cb   :  { %2644 = vmatprep.subr.mxu0 %v2776_v1 }
 0x36d   :  { %v1008_v13 = vpop.f32.mrf.mxu0 }
 0x36e   :  { %v1012_v14 = vmul.f32 0.001953125, %v1008_v13 }
 0x36f   :  { %v2573_v16 = vpop.f32.mrf.mxu0 }
 0x370   :  { %v1013_v17 = vadd.f32 1e-05, %v1012_v14 }
 0x372   :  { %2772 = vrsqrt.f32 %v1013_v17 }
 0x37f   :  { %v2773_v21 = vpop.eup %2772 }
 0x380   :  { %v1015_v23 = vmul.f32 %v2773_v21, %v765_v20 }
 0x382   :  { %2577 = vmatmul.mubr.msk.f32.vlgmr.msra.gmra.mxu1 %vm3622_vm3, %v1015_v23  ;;  %vm1234_vm3 = vcmask 1043456  }
 0x383   :  { %2580 = vmatpush3.msk.msra.mxu1 %vm3124_vm2, %v2777_v7  ;;  %2581 = vmatprep.mubr.msk.f32.mxu1 %vm3618_vm1, %v2776_v1 }
 0x384   :  { %2584 = vmatprep.subr.bf16.mxu1 %v2748_v27 }
 0x386   :  { %2582 = vmatmul.mubr.msk.f32.vlgmr.msra.gmra.mxu1 %vm3623_vm15, %v766_v24  ;;  %vm3624_vm15 = vsmask.f32 7938 }
 0x387   :  { %2585 = vmatpush3.bf16.msra.mxu1 %v2748_v27  ;;  %vm3299_vm2 = vmand %vm1234_vm3, %vm3624_vm15  ;;  %vm3628_vm3 = vnez %v3573_v9  ;;  %vm3631_vm15 = vnez %v3605_v40 }
 0x388   :  { %2586 = vmatprep.subr.bf16.mxu1 %v2750_v32 }
 0x38b   :  { %2587 = vmatpush3.bf16.msra.mxu1 %v2750_v32 }
 0x38c   :  { %2588 = vmatprep.subr.bf16.mxu1 %v2752_v35 }
 0x38f   :  { %2589 = vmatpush3.bf16.msra.mxu1 %v2752_v35 }
 0x390   :  { %2590 = vmatprep.subr.bf16.mxu1 %v2754_v39 }
 0x393   :  { %2591 = vmatpush3.bf16.msra.mxu1 %v2754_v39 }
 0x394   :  { %2592 = vmatprep.subr.bf16.mxu1 %v2756_v42 }
 0x397   :  { %2593 = vmatpush3.bf16.msra.mxu1 %v2756_v42 }
 0x398   :  { %2594 = vmatprep.subr.bf16.mxu1 %v2758_v47 }
 0x39b   :  { %2595 = vmatpush3.bf16.msra.mxu1 %v2758_v47 }
 0x39c   :  { %2596 = vmatprep.subr.bf16.mxu1 %v2761_v57 }
 0x39f   :  { %2597 = vmatpush3.bf16.msra.mxu1 %v2761_v57 }
 0x3a0   :  { %2598 = vmatprep.subr.bf16.mxu1 %v2763_v31 }
 0x3a3   :  { %2599 = vmatpush3.bf16.msra.mxu1 %v2763_v31 }
 0x3a4   :  { %2624 = vmatprep.subr.bf16.mxu1 %v3289_v62 }
 0x442   :  { %v1085_v58 = vpop.f32.mrf.mxu1 }
 0x443   :  { %v1165_v60 = vrot.slane %v1085_v58, %v3205_v44 }
 0x444   :  { %v2578_v61 = vpop.f32.mrf.mxu1 }
 0x445   :  { %v1166_v63 = vmul.f32 %v1165_v60, %v3208_v49  ;;  %v1167_v2 = vmul.f32 %v1165_v60, %v3210_v51  ;;  %v1168_v3 = vmul.f32 %v1165_v60, %v3212_v54  ;;  %v1169_v4 = vmul.f32 %v1165_v60, %v3214_v56  ;;  %v1242_v61 = vld [vmem:[#allocation2 + $0xc] sm:$0xf] }
 0x446   :  { %v1158_v0 = vpop.f32.mrf.mxu1 }
 0x447   :  { %v1173_v6 = vrot.slane %v1158_v0, %v3205_v44 }
 0x448   :  { %v2583_v10 = vpop.f32.mrf.mxu1 }
 0x449   :  { %v1174_v11 = vadd.f32 %v1173_v6, %v1166_v63  ;;  %v1175_v13 = vadd.f32 %v1173_v6, %v1167_v2  ;;  %v1176_v14 = vadd.f32 %v1173_v6, %v1168_v3  ;;  %v1177_v16 = vadd.f32 %v1173_v6, %v1169_v4  ;;  %v1246_v63 = vld [vmem:[#allocation2 + $0x14] sm:$0x1] }
 0x44b   :  { %v1178_v17 = vmax.f32 %v1174_v11, 0.0  ;;  %v1179_v20 = vmax.f32 %v1175_v13, 0.0  ;;  %v1180_v21 = vmax.f32 %v1176_v14, 0.0  ;;  %v1181_v23 = vmax.f32 %v1177_v16, 0.0 }
 0x44d   :  { %v2331_v24 = vpack.c.bf16 %v1178_v17, %v1178_v17  ;;  %v2332_v49 = vpack.c.bf16 %v1179_v20, %v1179_v20  ;;  %v2333_v26 = vpack.c.bf16 %v1180_v21, %v1180_v21  ;;  %v2334_v27 = vpack.c.bf16 %v1181_v23, %v1181_v23 }
 0x44f   :  { %v1195_v51 = vshrl.u32 %v2331_v24, 16  ;;  %v1203_v30 = vshrl.u32 %v2332_v49, 16  ;;  %v1212_v54 = vshrl.u32 %v2333_v26, 16  ;;  %v1220_v56 = vshrl.u32 %v2334_v27, 16 }
 0x450   :  { %v1198_v34 = vshll.u32 %v2331_v24, 16  ;;  %v1206_v38 = vshll.u32 %v2332_v49, 16  ;;  %v1215_v41 = vshll.u32 %v2333_v26, 16  ;;  %v1223_v45 = vshll.u32 %v2334_v27, 16 }
 0x451   :  { %v1197_v32 = vrot.slane %v1195_v51, 7  ;;  %v1205_v35 = vrot.slane %v1203_v30, 7  ;;  %v1214_v39 = vrot.slane %v1212_v54, 7  ;;  %v1222_v42 = vrot.slane %v1220_v56, 7 }
 0x453   :  { %v1200_v57 = vor.u32 %v1198_v34, %v1197_v32  ;;  %v1201_v31 = vrot.slane %v1197_v32, 4  ;;  %v1208_v58 = vor.u32 %v1206_v38, %v1205_v35  ;;  %v1210_v60 = vrot.slane %v1205_v35, 4 }
 0x454   :  { %v1217_v0 = vor.u32 %v1215_v41, %v1214_v39  ;;  %v1218_v2 = vrot.slane %v1214_v39, 4  ;;  %v1225_v3 = vor.u32 %v1223_v45, %v1222_v42  ;;  %v1227_v4 = vrot.slane %v1222_v42, 4 }
 0x455   :  { %v1209_v6 = vsel %vm3627_vm0, %v1201_v31, %v1208_v58  ;;  %v1236_v10 = vsel %vm3299_vm2, %v1200_v57, %v2903_v59  ;;  %v1240_v11 = vsel %vm3628_vm3, %v1210_v60, %v1239_v48 }
 0x456   :  { %v1226_v13 = vsel %vm3627_vm0, %v1218_v2, %v1225_v3  ;;  %1237 = vst [vmem:[#allocation2] sm:$0xf] %v1236_v10  ;;  %1238 = vst [vmem:[#allocation2 + $0x4] sm:$0xf] %v1209_v6  ;;  %v1243_v14 = vsel %vm3299_vm2, %v1217_v0, %v1242_v61  ;;  %v1247_v16 = vsel %vm3628_vm3, %v1227_v4, %v1246_v63  ;;  %vm3629_vm2 = vnez %v3581_v19  ;;  %v2766_v19 = vld [vmem:[%s3539_s4 + $0xa8] sm:$0xff]  }
 0x457   :  { %1241 = vst [vmem:[#allocation2 + $0x8] sm:$0x1] %v1240_v11  ;;  %1244 = vst [vmem:[#allocation2 + $0xc] sm:$0xf] %v1243_v14  ;;  %vm3630_vm0 = vnez %v3583_v28  ;;  %vm3632_vm3 = vnez %v3607_v43 }
 0x458   :  { %1245 = vst [vmem:[#allocation2 + $0x10] sm:$0xf] %v1226_v13  ;;  %1248 = vst [vmem:[#allocation2 + $0x14] sm:$0x1] %v1247_v16 }
 0x45d   :  { %v1249_v17 = vld [vmem:[#allocation2] sm:$0xf]  ;;  %v1250_v59 = vld [vmem:[#allocation2 + $0x4] sm:$0xf] }
 0x45e   :  { %v1269_v20 = vld [vmem:[#allocation2 + $0x8] sm:$0x1]  ;;  %v1272_v21 = vshrl.u32 %v1249_v17, 16  ;;  %v1275_v23 = vshll.u32 %v1249_v17, 16  ;;  %v1285_v24 = vshrl.u32 %v1250_v59, 16  ;;  %v2251_v36 = vcombine.low %v1249_v17, %v1250_v59 }
 0x45f   :  { %v1251_v49 = vld [vmem:[#allocation2 + $0xc] sm:$0xf]  ;;  %v3316_v26 = vld [vmem:[#allocation2 + $0x10] sm:$0xf]  ;;  %v1281_v30 = vshll.u32 %v1250_v59, 16  ;;  %v1291_v54 = vshll.u32 %v1269_v20, 16 }
 0x460   :  { %v1296_v27 = vshrl.u32 %v1251_v49, 16  ;;  %v1299_v51 = vshll.u32 %v1251_v49, 16  ;;  %v1274_v56 = vrot.slane %v1272_v21, 4  ;;  %v1277_v9 = vrot.slane %v1275_v23, 5  ;;  %2620 = vmatprep.mubr.bf16.mxu0 %v2251_v36  ;;  %v3320_v42 = vld [vmem:[#allocation2 + $0x14] sm:$0x1] }
 0x461   :  { %v1309_v32 = vshrl.u32 %v3316_v26, 16  ;;  %v2252_v34 = vcombine.low %v1251_v49, %v3316_v26  ;;  %v1283_v39 = vrot.slane %v1281_v30, 5  ;;  %v1287_v41 = vrot.slane %v1285_v24, 4  ;;  %v1550_v63 = vld [vmem:[#allocation2] sm:$0xe]  ;;  %v2768_v30 = vld [vmem:[%s3539_s4 + $0x98] sm:$0xff]  }
 0x462   :  { %v1298_v35 = vrot.slane %v1296_v27, 4  ;;  %v1301_v38 = vrot.slane %v1299_v51, 5  ;;  %v1278_v45 = vor.u32 %v1277_v9, %v1274_v56  ;;  %v1305_v47 = vshll.u32 %v3316_v26, 16  ;;  %v2765_v27 = vld [vmem:[%s3539_s4 + $0xb0] sm:$0xff]   ;;  %v2770_v56 = vld [vmem:[%s3539_s4 + $0x88] sm:$0xff]  }
 0x463   :  { %2621 = vmatmul.mubr.bf16.vlgmr.msra.gmra.mxu0 %v2252_v34  ;;  %v1311_v48 = vrot.slane %v1309_v32, 4  ;;  %v1288_v57 = vor.u32 %v1287_v41, %v1283_v39  ;;  %v1315_v61 = vshll.u32 %v3320_v42, 16  ;;  %v1558_v0 = vrot.slane %v1250_v59, 5  ;;  %v2771_v32 = vld [vmem:[%s3539_s4 + $0x80] sm:$0xff]   ;;  %v1551_v34 = vld [vmem:[#allocation2 + $0xc] sm:$0xe] }
 0x464   :  { %v1302_v31 = vor.u32 %v1301_v38, %v1298_v35  ;;  %2645 = vmatpush3.msk.msra.mxu0 %vm2961_vm4, %v2777_v7  ;;  %2676 = vmatprep.mubr.msk.f32.mxu0 %vm3618_vm1, %v2776_v1  ;;  %v1279_v58 = vrot.slane %v1278_v45, 4  ;;  %v1307_v60 = vrot.slane %v1305_v47, 5  ;;  %v1293_v3 = vrot.slane %v1291_v54, 5  ;;  %v2769_v54 = vld [vmem:[%s3539_s4 + $0x90] sm:$0xff]  }
 0x465   :  { %2646 = vmatprep.subr.mxu0 %v2776_v1  ;;  %v1289_v2 = vrot.slane %v1288_v57, 4  ;;  %v1560_v11 = vrot.slane %v1558_v0, 4  ;;  %v2261_v14 = vrot.slane %v1550_v63, 9  ;;  %v1561_v16 = vrot.slane %v1269_v20, 5 }
 0x466   :  { %v1303_v4 = vrot.slane %v1302_v31, 4  ;;  %2647 = vmatpush3.msk.msra.mxu0 %vm2970_vm5, %v2777_v7  ;;  %v1284_v6 = vsel %vm3629_vm2, %v1279_v58, %v1283_v39  ;;  %v1312_v10 = vor.u32 %v1311_v48, %v1307_v60  ;;  %v1317_v23 = vrot.slane %v1315_v61, 5 }
 0x467   :  { %2648 = vmatprep.subr.mxu0 %v2776_v1  ;;  %v1294_v13 = vsel %vm3629_vm2, %v1289_v2, %v1293_v3  ;;  %v1562_v24 = vsel %vm3630_vm0, %v1560_v11, %v1561_v16  ;;  %v1559_v49 = vsel %vm3630_vm0, %v2261_v14, %v1558_v0  ;;  %v1565_v9 = vrot.slane %v3316_v26, 5 }
 0x468   :  { %2649 = vmatpush3.msk.msra.mxu0 %vm2981_vm6, %v2777_v7  ;;  %v2241_v17 = vcombine.low %v1284_v6, %v1294_v13  ;;  %v1308_v59 = vsel %vm3629_vm2, %v1303_v4, %v1307_v60  ;;  %v1313_v21 = vrot.slane %v1312_v10, 4  ;;  %v2279_v51 = vcombine.low %v1559_v49, %v1562_v24 }
 0x469   :  { %2650 = vmatprep.subr.mxu0 %v2776_v1  ;;  %v1567_v26 = vrot.slane %v1565_v9, 4  ;;  %v2262_v35 = vrot.slane %v1551_v34, 9  ;;  %v1568_v38 = vrot.slane %v3320_v42, 5 }
 0x46a   :  { %2651 = vmatpush3.msk.msra.mxu0 %vm2991_vm7, %v2777_v7  ;;  %2600 = vmatprep.mubr.bf16.mxu1 %v2241_v17  ;;  %v1318_v20 = vsel %vm3629_vm2, %v1313_v21, %v1317_v23  ;;  %vm3633_vm2 = vnez %v3611_v50 }
 0x46b   :  { %2652 = vmatprep.subr.mxu0 %v2776_v1  ;;  %v2242_v36 = vcombine.low %v1308_v59, %v1318_v20  ;;  %v1569_v39 = vsel %vm3630_vm0, %v1567_v26, %v1568_v38  ;;  %v1566_v41 = vsel %vm3630_vm0, %v2262_v35, %v1565_v9  ;;  %v1696_v38 = vld [vmem:[%s3542_s5] sm:$0x1] }
 0x46c   :  { %2653 = vmatpush3.msk.msra.mxu0 %vm3001_vm8, %v2777_v7  ;;  %v2280_v45 = vcombine.low %v1566_v41, %v1569_v39 }
 0x46d   :  { %2654 = vmatprep.subr.mxu0 %v2776_v1  ;;  %2601 = vmatmul.mubr.bf16.vlgmr.msra.gmra.mxu1 %v2242_v36 }
 0x46e   :  { %2655 = vmatpush3.msk.msra.mxu0 %vm3011_vm10, %v2777_v7  ;;  %2625 = vmatpush3.bf16.msra.mxu1 %v3289_v62  ;;  %v2767_v62 = vld [vmem:[%s3539_s4 + $0xa0] sm:$0xff]  }
 0x46f   :  { %2640 = vmatprep.mubr.bf16.mxu1 %v2279_v51  ;;  %2626 = vmatprep.subr.bf16.mxu1 %v2765_v27 }
 0x470   :  { %2656 = vmatprep.subr.mxu0 %v2776_v1 }
 0x471   :  { %2657 = vmatpush3.msk.msra.mxu0 %vm3021_vm11, %v2777_v7 }
 0x472   :  { %2658 = vmatprep.subr.mxu0 %v2776_v1  ;;  %2627 = vmatpush3.bf16.msra.mxu1 %v2765_v27 }
 0x473   :  { %2659 = vmatpush3.msk.msra.mxu0 %vm3031_vm12, %v2777_v7  ;;  %2628 = vmatprep.subr.bf16.mxu1 %v2766_v19 }
 0x474   :  { %2660 = vmatprep.subr.mxu0 %v2776_v1 }
 0x475   :  { %2661 = vmatpush3.msk.msra.mxu0 %vm3041_vm13, %v2777_v7 }
 0x476   :  { %2662 = vmatprep.subr.mxu0 %v2776_v1  ;;  %2629 = vmatpush3.bf16.msra.mxu1 %v2766_v19 }
 0x477   :  { %2663 = vmatpush3.msk.msra.mxu0 %vm3051_vm14, %v2777_v7  ;;  %2630 = vmatprep.subr.bf16.mxu1 %v2767_v62 }
 0x478   :  { %2664 = vmatprep.subr.mxu0 %v2776_v1 }
 0x479   :  { %2665 = vmatpush3.msk.msra.mxu0 %vm3631_vm15, %v2777_v7 }
 0x47a   :  { %2666 = vmatprep.subr.mxu0 %v2776_v1  ;;  %2631 = vmatpush3.bf16.msra.mxu1 %v2767_v62 }
 0x47b   :  { %2667 = vmatpush3.msk.msra.mxu0 %vm3632_vm3, %v2777_v7  ;;  %2632 = vmatprep.subr.bf16.mxu1 %v2768_v30  ;;  %vm3634_vm3 = vnez %v3613_v52 }
 0x47c   :  { %2668 = vmatprep.subr.mxu0 %v2776_v1 }
 0x47d   :  { %2669 = vmatpush3.msk.msra.mxu0 %vm3619_vm9, %v2777_v7  ;;  %vm3635_vm9 = vnez %v3615_v53 }
 0x47e   :  { %2670 = vmatprep.subr.mxu0 %v2776_v1  ;;  %2633 = vmatpush3.bf16.msra.mxu1 %v2768_v30 }
 0x47f   :  { %2671 = vmatpush3.msk.msra.mxu0 %vm3633_vm2, %v2777_v7  ;;  %2634 = vmatprep.subr.bf16.mxu1 %v2769_v54 }
 0x480   :  { %2672 = vmatprep.subr.mxu0 %v2776_v1 }
 0x481   :  { %2673 = vmatpush3.msk.msra.mxu0 %vm3634_vm3, %v2777_v7 }
 0x482   :  { %2674 = vmatprep.subr.mxu0 %v2776_v1  ;;  %2635 = vmatpush3.bf16.msra.mxu1 %v2769_v54 }
 0x483   :  { %2675 = vmatpush3.msk.msra.mxu0 %vm3635_vm9, %v2777_v7  ;;  %2636 = vmatprep.subr.bf16.mxu1 %v2770_v56 }
 0x484   :  { %2679 = vmatprep.subr.mxu0 %v2776_v1 }
 0x486   :  { %2637 = vmatpush3.bf16.msra.mxu1 %v2770_v56 }
 0x487   :  { %2638 = vmatprep.subr.bf16.mxu1 %v2771_v32 }
 0x48a   :  { %2639 = vmatpush3.bf16.msra.mxu1 %v2771_v32 }
 0x48b   :  { %2684 = vmatprep.subr.mxu1 %v2776_v1 }
 0x48d   :  { %2641 = vmatmul.mubr.bf16.vlgmr.msra.gmra.mxu1 %v2280_v45  ;;  %v1697_v45 = vld [vmem:[%s3543_s6] sm:$0x1] }
 0x48e   :  { %2685 = vmatpush3.msk.msra.mxu1 %vm2961_vm4, %v2777_v7  ;;  %2716 = vmatprep.mubr.msk.f32.mxu1 %vm3618_vm1, %v2776_v1  ;;  %vm3636_vm4 = vnez %v3607_v43 }
 0x48f   :  { %2686 = vmatprep.subr.mxu1 %v2776_v1 }
 0x490   :  { %2687 = vmatpush3.msk.msra.mxu1 %vm2970_vm5, %v2777_v7  ;;  %vm3637_vm5 = vnez %v3609_v46 }
 0x491   :  { %2688 = vmatprep.subr.mxu1 %v2776_v1 }
 0x492   :  { %2689 = vmatpush3.msk.msra.mxu1 %vm2981_vm6, %v2777_v7  ;;  %vm3639_vm6 = vcmask 64512  }
 0x493   :  { %2690 = vmatprep.subr.mxu1 %v2776_v1 }
 0x494   :  { %2691 = vmatpush3.msk.msra.mxu1 %vm2991_vm7, %v2777_v7  ;;  %vm3640_vm7 = vmmov %vm3639_vm6 }
 0x495   :  { %2692 = vmatprep.subr.mxu1 %v2776_v1 }
 0x496   :  { %2693 = vmatpush3.msk.msra.mxu1 %vm3001_vm8, %v2777_v7  ;;  %vm3641_vm8 = vmmov %vm3639_vm6 }
 0x497   :  { %2694 = vmatprep.subr.mxu1 %v2776_v1 }
 0x498   :  { %2695 = vmatpush3.msk.msra.mxu1 %vm3011_vm10, %v2777_v7 }
 0x499   :  { %2696 = vmatprep.subr.mxu1 %v2776_v1 }
 0x49a   :  { %2697 = vmatpush3.msk.msra.mxu1 %vm3021_vm11, %v2777_v7 }
 0x49b   :  { %2698 = vmatprep.subr.mxu1 %v2776_v1 }
 0x49c   :  { %2699 = vmatpush3.msk.msra.mxu1 %vm3031_vm12, %v2777_v7 }
 0x49d   :  { %2700 = vmatprep.subr.mxu1 %v2776_v1 }
 0x49e   :  { %2701 = vmatpush3.msk.msra.mxu1 %vm3041_vm13, %v2777_v7 }
 0x49f   :  { %2702 = vmatprep.subr.mxu1 %v2776_v1 }
 0x4a0   :  { %2703 = vmatpush3.msk.msra.mxu1 %vm3051_vm14, %v2777_v7 }
 0x4a1   :  { %2704 = vmatprep.subr.mxu1 %v2776_v1 }
 0x4a2   :  { %2705 = vmatpush3.msk.msra.mxu1 %vm3631_vm15, %v2777_v7 }
 0x4a3   :  { %2706 = vmatprep.subr.mxu1 %v2776_v1 }
 0x4a4   :  { %2707 = vmatpush3.msk.msra.mxu1 %vm3636_vm4, %v2777_v7 }
 0x4a5   :  { %2708 = vmatprep.subr.mxu1 %v2776_v1 }
 0x4a6   :  { %2709 = vmatpush3.msk.msra.mxu1 %vm3637_vm5, %v2777_v7 }
 0x4a7   :  { %2710 = vmatprep.subr.mxu1 %v2776_v1 }
 0x4a8   :  { %2711 = vmatpush3.msk.msra.mxu1 %vm3633_vm2, %v2777_v7 }
 0x4a9   :  { %2712 = vmatprep.subr.mxu1 %v2776_v1 }
 0x4aa   :  { %2713 = vmatpush3.msk.msra.mxu1 %vm3634_vm3, %v2777_v7 }
 0x4ab   :  { %2714 = vmatprep.subr.mxu1 %v2776_v1 }
 0x4ac   :  { %2715 = vmatpush3.msk.msra.mxu1 %vm3635_vm9, %v2777_v7  ;;  %vm3638_vm9 = vnez %v3617_v55 }
 0x523   :  { %v2622_v8 = vpop.f32.mrf.mxu0 }
 0x525   :  { %v1535_v15 = vpop.f32.mrf.mxu0 }
 0x527   :  { %v2623_v22 = vpop.f32.mrf.mxu0 }
 0x529   :  { %v1538_v33 = vpop.f32.mrf.mxu0 }
 0x52d   :  { %v2602_v28 = vpop.f32.mrf.mxu1 }
 0x52e   :  { %v1544_v50 = vadd.f32 %v2622_v8, %v2602_v28 }
 0x52f   :  { %v1426_v5 = vpop.f32.mrf.mxu1 }
 0x530   :  { %v1536_v40 = vadd.f32 %v1535_v15, %v1426_v5 }
 0x531   :  { %v2603_v12 = vpop.f32.mrf.mxu1 }
 0x532   :  { %v1547_v47 = vadd.f32 %v2623_v22, %v2603_v12 }
 0x533   :  { %v1429_v18 = vpop.f32.mrf.mxu1 }
 0x534   :  { %v1539_v43 = vadd.f32 %v1538_v33, %v1429_v18 }
 0x54d   :  { %v2642_v25 = vpop.f32.mrf.mxu1 }
 0x54e   :  { %v1694_v53 = vadd.f32 %v2642_v25, %v1544_v50 }
 0x54f   :  { %v1677_v29 = vpop.f32.mrf.mxu1 }
 0x550   :  { %v1692_v52 = vadd.f32 %v1677_v29, %v1536_v40 }
 0x551   :  { %v2643_v37 = vpop.f32.mrf.mxu1 }
 0x552   :  { %v1695_v57 = vadd.f32 %v2643_v37, %v1547_v47 }
 0x553   :  { %v1680_v46 = vpop.f32.mrf.mxu1 }
 0x554   :  { %v1693_v42 = vadd.f32 %v1680_v46, %v1539_v43 }
 0x556   :  { %v1698_v48 = vadd.f32 %v1693_v42, %v1692_v52 }
 0x558   :  { %v1699_v31 = vadd.f32 %v1698_v48, %v1694_v53 }
 0x55a   :  { %v1700_v58 = vadd.f32 %v1699_v31, %v1695_v57 }
 0x55c   :  { %v1701_v60 = vrot.slane %v1700_v58, 4 }
 0x55e   :  { %v1702_v61 = vadd.f32 %v1701_v60, %v1700_v58 }
 0x560   :  { %v1703_v63 = vrot.slane %v1702_v61, 2 }
 0x562   :  { %v1704_v0 = vadd.f32 %v1703_v63, %v1702_v61 }
 0x564   :  { %v1705_v2 = vrot.slane %v1704_v0, 1 }
 0x566   :  { %v1706_v3 = vadd.f32 %v1705_v2, %v1704_v0 }
 0x568   :  { %2677 = vmatmul.mubr.f32.vlgmr.msra.gmra.mxu0 %v1706_v3 }
 0x569   :  { %2680 = vmatpush3.msk.msra.mxu0 %vm3638_vm9, %v2777_v7  ;;  %2681 = vmatprep.mubr.msk.f32.mxu0 %vm3618_vm1, %v2776_v1 }
 0x56a   :  { %2719 = vmatprep.subr.mxu0 %v2776_v1 }
 0x628   :  { %v1773_v4 = vpop.f32.mrf.mxu0 }
 0x629   :  { %v1777_v6 = vmul.f32 0.001953125, %v1773_v4 }
 0x62a   :  { %v2678_v10 = vpop.f32.mrf.mxu0 }
 0x62b   :  { %2682 = vmatmul.mubr.msk.f32.vlgmr.msra.gmra.mxu0 %vm3639_vm6, %v1777_v6 }
 0x62c   :  { %2720 = vmatpush3.msk.msra.mxu0 %vm3638_vm9, %v2777_v7  ;;  %2721 = vmatprep.mubr.msk.f32.mxu0 %vm3618_vm1, %v2776_v1 }
 0x62d   :  { %2724 = vmatprep.subr.mxu0 %v2776_v1 }
 0x6eb   :  { %v1847_v11 = vpop.f32.mrf.mxu0 }
 0x6ec   :  { %v1854_v13 = vrot.slane %v1847_v11, %v3205_v44 }
 0x6ed   :  { %v2683_v14 = vpop.f32.mrf.mxu0 }
 0x6ee   :  { %v1855_v16 = vsub.f32 %v1692_v52, %v1854_v13  ;;  %v1856_v17 = vsub.f32 %v1693_v42, %v1854_v13  ;;  %v1857_v59 = vsub.f32 %v1694_v53, %v1854_v13  ;;  %v1858_v21 = vsub.f32 %v1695_v57, %v1854_v13 }
 0x6f0   :  { %v1859_v23 = vmul.f32 %v1855_v16, %v1855_v16  ;;  %v1860_v24 = vmul.f32 %v1856_v17, %v1856_v17  ;;  %v1861_v20 = vmul.f32 %v1857_v59, %v1857_v59  ;;  %v1862_v49 = vmul.f32 %v1858_v21, %v1858_v21 }
 0x6f2   :  { %v1863_v36 = vadd.f32 %v1860_v24, %v1859_v23 }
 0x6f4   :  { %v1864_v27 = vadd.f32 %v1863_v36, %v1861_v20 }
 0x6f6   :  { %v1865_v51 = vadd.f32 %v1864_v27, %v1862_v49 }
 0x6f8   :  { %v1866_v19 = vrot.slane %v1865_v51, 4 }
 0x6fa   :  { %v1867_v62 = vadd.f32 %v1866_v19, %v1865_v51 }
 0x6fc   :  { %v1868_v30 = vrot.slane %v1867_v62, 2 }
 0x6fe   :  { %v1869_v54 = vadd.f32 %v1868_v30, %v1867_v62 }
 0x700   :  { %v1870_v56 = vrot.slane %v1869_v54, 1 }
 0x702   :  { %v1871_v9 = vadd.f32 %v1870_v56, %v1869_v54 }
 0x704   :  { %2717 = vmatmul.mubr.f32.vlgmr.msra.gmra.mxu1 %v1871_v9 }
 0x7c4   :  { %v1938_v32 = vpop.f32.mrf.mxu1 }
 0x7c5   :  { %v1942_v34 = vmul.f32 0.001953125, %v1938_v32 }
 0x7c6   :  { %v2718_v26 = vpop.f32.mrf.mxu1 }
 0x7c7   :  { %v1943_v35 = vadd.f32 1e-05, %v1942_v34 }
 0x7c9   :  { %2774 = vrsqrt.f32 %v1943_v35 }
 0x7d6   :  { %v2775_v39 = vpop.eup %2774 }
 0x7d7   :  { %v1945_v41 = vmul.f32 %v2775_v39, %v1696_v38 }
 0x7d9   :  { %2722 = vmatmul.mubr.msk.f32.vlgmr.msra.gmra.mxu0 %vm3640_vm7, %v1945_v41 }
 0x7da   :  { %2725 = vmatpush3.msk.msra.mxu0 %vm3638_vm9, %v2777_v7  ;;  %2726 = vmatprep.mubr.msk.f32.mxu0 %vm3618_vm1, %v2776_v1 }
 0x7dd   :  { %2727 = vmatmul.mubr.msk.f32.vlgmr.msra.gmra.mxu0 %vm3641_vm8, %v1697_v45 }
 0x899   :  { %v2015_v28 = vpop.f32.mrf.mxu0 }
 0x89a   :  { %v2095_v5 = vrot.slane %v2015_v28, %v3205_v44 }
 0x89b   :  { %v2723_v8 = vpop.f32.mrf.mxu0 }
 0x89c   :  { %v2096_v12 = vmul.f32 %v2095_v5, %v1855_v16  ;;  %v2097_v18 = vmul.f32 %v2095_v5, %v1856_v17  ;;  %v2098_v22 = vmul.f32 %v2095_v5, %v1857_v59  ;;  %v2099_v25 = vmul.f32 %v2095_v5, %v1858_v21 }
 0x89d   :  { %v2088_v15 = vpop.f32.mrf.mxu0 }
 0x89e   :  { %v2103_v7 = vrot.slane %v2088_v15, %v3205_v44 }
 0x89f   :  { %v2728_v55 = vpop.f32.mrf.mxu0 }
 0x8a0   :  { %v2104_v29 = vadd.f32 %v2103_v7, %v2096_v12  ;;  %v2105_v1 = vadd.f32 %v2103_v7, %v2097_v18  ;;  %v2106_v33 = vadd.f32 %v2103_v7, %v2098_v22  ;;  %v2107_v37 = vadd.f32 %v2103_v7, %v2099_v25 }
 0x8a2   :  { %v2108_v40 = vmax.f32 %v2104_v29, 0.0  ;;  %v2109_v43 = vmax.f32 %v2105_v1, 0.0  ;;  %v2110_v46 = vmax.f32 %v2106_v33, 0.0  ;;  %v2111_v50 = vmax.f32 %v2107_v37, 0.0 }
 0x8a4   :  { %2112 = vst [vmem:[%s3544_s7] sm:$0xff] %v2108_v40  ;;  %2113 = vst [vmem:[%s3544_s7 + $0x8] sm:$0xff] %v2109_v43 }
 0x8a5   :  { %2114 = vst [vmem:[%s3544_s7 + $0x10] sm:$0xff] %v2110_v46  ;;  %2115 = vst [vmem:[%s3544_s7 + $0x18] sm:$0xff] %v2111_v50 }

</bundles_post_ra>
